<compile_context>
chip_gen: v6e
topology: v6e:2x2x1
jax: 0.10.0
libtpu: 0.0.40
codegen_flags: <defaults>
</compile_context>

<pallas_src>
import functools

import numpy as np
import jax
import jax.numpy as jnp
from jax import lax
from jax.experimental import pallas as pl
from jax.experimental.pallas import tpu as pltpu

NEG_SLOPE = 0.01  # nn.LeakyReLU() default negative_slope


def _leaky(x):
    return jnp.where(x > 0, x, NEG_SLOPE * x)


def _round_up(x, m):
    return (x + m - 1) // m * m


# ------------------------------- fused kernel --------------------------------

def _fused_down_res_kernel(x_ref, w1_ref, wcat_ref, b1_ref, bcat_ref,
                           mask_ref, subidx_ref, out_ref, cat_ref, *,
                           H, W, C, HID, OUT, PADW):
    """One batch image per grid step, channels-major flat-spatial layout.

    x_ref     : (1, C, PADW)       bf16  padded image, (H+2, W+2) flattened on lanes
    w1_ref    : (9, HID, C)        bf16  3x3 conv, one (co, ci) matrix per tap
    wcat_ref  : (16, OUT, HID+C)   bf16  [w2 ; w3] stacked on ci, per 4x4 tap
    b1_ref    : (HID, 1)           f32
    bcat_ref  : (OUT, 1)           f32   b2 + b3
    mask_ref  : (1, PADW)          f32   kills wrap-around garbage columns
    subidx_ref: (1, HO*WO)         i32   flat stride-2 output positions
    out_ref   : (1, OUT, HO*WO)    f32   spatial on lanes -> NCHW is a free reshape
    cat_ref   : (HID+C, PADW)      f32   VMEM scratch: [hid (padded) ; x (padded)]
    """
    Wp = W + 2
    M = H * Wp          # flat extent processed by both stages (garbage cols masked)
    OFF = Wp + 1        # flat offset of padded-interior origin (row 1, col 1)

    xT = x_ref[0]       # (C, PADW) bf16

    # ---- stage 1: 3x3 s1 p1 conv as 9 shifted-slice matmuls, f32 accumulation ----
    acc1 = jnp.zeros((HID, M), jnp.float32)
    for kh in range(3):
        for kw in range(3):
            s = kh * Wp + kw
            acc1 = acc1 + jnp.dot(w1_ref[kh * 3 + kw],          # (HID, C)
                                  xT[:, s:s + M],               # (C, M)
                                  preferred_element_type=jnp.float32)
    # bias + LeakyReLU; mask zeroes the two wrap-around garbage columns per row so
    # the stage-2 conv sees proper zero padding for hid.
    hid = _leaky(acc1 + b1_ref[...]) * mask_ref[:, :M]          # (HID, M) f32
    # place hid at the padded-interior offsets of the concat buffer (rows [0, HID))
    cat_ref[0:HID, :] = jnp.concatenate(
        [jnp.zeros((HID, OFF), jnp.float32),
         hid,
         jnp.zeros((HID, PADW - OFF - M), jnp.float32)], axis=1)
    # residual/side input shares the same padded flat layout -> channel concat in VMEM
    cat_ref[HID:HID + C, :] = xT.astype(jnp.float32)

    # ---- stage 2: fused (main 4x4 s2 p1 on hid) + (side 4x4 s2 p1 on x) -----------
    # computed at stride 1 over the flat layout (16 shifted-slice matmuls with
    # K = HID + C), then subsampled to stride 2 with a 0/1 selector matmul.
    acc2 = jnp.zeros((OUT, M), jnp.float32)
    for kh in range(4):
        for kw in range(4):
            s = kh * Wp + kw
            acc2 = acc2 + jnp.dot(
                wcat_ref[kh * 4 + kw],                          # (OUT, HID+C) bf16
                cat_ref[:, s:s + M].astype(jnp.bfloat16),       # (HID+C, M)   bf16
                preferred_element_type=jnp.float32)

    # stride-2 subsample via selector matmul: out[:, j] = acc2[:, subidx[j]]
    m_idx = lax.broadcasted_iota(jnp.int32, (M, 1), 0)
    sel = (m_idx == subidx_ref[...]).astype(jnp.float32)        # (M, HO*WO)
    sub = jnp.dot(acc2, sel, preferred_element_type=jnp.float32)  # (OUT, HO*WO)
    out_ref[0] = _leaky(sub + bcat_ref[...]).astype(out_ref.dtype)


# ------------------------------ wrapper (NCHW) --------------------------------

def down_res_block_3x3_forward(x, params):
    """Forward pass equivalent to downResBlock_3x3 (Identity norm, LeakyReLU)."""
    w1, b1 = params["w1"], params["b1"]
    w2, b2 = params["w2"], params["b2"]
    w3, b3 = params["w3"], params["b3"]
    N, C, H, W = x.shape
    HID = w1.shape[0]
    OUT = w2.shape[0]
    HO = (H + 2 - 4) // 2 + 1
    WO = (W + 2 - 4) // 2 + 1
    Hp, Wp = H + 2, W + 2
    CH_CAT = HID + C
    # flat lane width: enough for the furthest shifted slice, rounded to 128 lanes
    PADW = _round_up((H + 3) * Wp + 3, 128)

    # ---- input: NCHW is already channels-major; cast to bf16 BEFORE padding,
    #      zero-pad spatially, flatten (H+2)*(W+2) onto the lane axis (one fused copy).
    x_b = x.astype(jnp.bfloat16)
    x_p = jnp.pad(x_b, ((0, 0), (0, 0), (1, 1), (1, 1)))
    x_flat = x_p.reshape(N, C, Hp * Wp)
    x_flat = jnp.pad(x_flat, ((0, 0), (0, 0), (0, PADW - Hp * Wp)))

    # ---- weights: per-tap (co, ci) matrices, bf16 (resident in VMEM across steps)
    w1_taps = jnp.transpose(w1, (2, 3, 0, 1)).reshape(9, HID, C).astype(jnp.bfloat16)
    wcat = jnp.concatenate([w2, w3], axis=1)                       # (OUT, HID+C, 4, 4)
    wcat_taps = (jnp.transpose(wcat, (2, 3, 0, 1))
                 .reshape(16, OUT, CH_CAT).astype(jnp.bfloat16))
    b1_col = b1.reshape(HID, 1).astype(jnp.float32)
    bcat_col = (b2 + b3).reshape(OUT, 1).astype(jnp.float32)

    # ---- tiny host-built constants (avoid in-kernel integer div/mod by non-pow2) ----
    m = np.arange(PADW)
    mask = ((m % Wp) < W) & (m < H * Wp)
    mask = jnp.asarray(mask.astype(np.float32).reshape(1, PADW))
    j = np.arange(HO * WO)
    sub_idx = (2 * ((j // WO) * Wp + (j % WO))).astype(np.int32).reshape(1, HO * WO)
    sub_idx = jnp.asarray(sub_idx)

    kernel = functools.partial(
        _fused_down_res_kernel,
        H=H, W=W, C=C, HID=HID, OUT=OUT, PADW=PADW)

    out_flat = pl.pallas_call(
        kernel,
        out_shape=jax.ShapeDtypeStruct((N, OUT, HO * WO), jnp.float32),
        grid=(N,),
        in_specs=[
            pl.BlockSpec((1, C, PADW), lambda n: (n, 0, 0)),       # streamed per image
            pl.BlockSpec((9, HID, C), lambda n: (0, 0, 0)),        # resident
            pl.BlockSpec((16, OUT, CH_CAT), lambda n: (0, 0, 0)),  # resident
            pl.BlockSpec((HID, 1), lambda n: (0, 0)),              # resident
            pl.BlockSpec((OUT, 1), lambda n: (0, 0)),              # resident
            pl.BlockSpec((1, PADW), lambda n: (0, 0)),             # resident
            pl.BlockSpec((1, HO * WO), lambda n: (0, 0)),          # resident
        ],
        out_specs=pl.BlockSpec((1, OUT, HO * WO), lambda n: (n, 0, 0)),
        scratch_shapes=[pltpu.VMEM((CH_CAT, PADW), jnp.float32)],
        compiler_params=pltpu.CompilerParams(
            dimension_semantics=("parallel",),   # batch splits across v7x TensorCores
            vmem_limit_bytes=32 * 1024 * 1024,
        ),
    )(x_flat, w1_taps, wcat_taps, b1_col, bcat_col, mask, sub_idx)

    # free reshape -- already in (N, C_out, Ho, Wo) channel-major order
    return out_flat.reshape(N, OUT, HO, WO)


# ------------------------ deterministic parameter init ------------------------

def init_params(key, in_c, out_c, hid_c):
    ks = jax.random.split(key, 6)

    def cw(k, o, i, kh, kw):
        fan_in = i * kh * kw
        return jax.random.normal(k, (o, i, kh, kw), jnp.float32) / np.sqrt(fan_in)

    return {
        "w1": cw(ks[0], hid_c, in_c, 3, 3),
        "b1": jax.random.normal(ks[1], (hid_c,), jnp.float32) * 0.05,
        "w2": cw(ks[2], out_c, hid_c, 4, 4),
        "b2": jax.random.normal(ks[3], (out_c,), jnp.float32) * 0.05,
        "w3": cw(ks[4], out_c, in_c, 4, 4),
        "b3": jax.random.normal(ks[5], (out_c,), jnp.float32) * 0.05,
    }


# --------------------------------- reference ----------------------------------

def _torch_like_conv(x, w, b, stride, pad):
    y = lax.conv_general_dilated(
        x, w, window_strides=(stride, stride),
        padding=[(pad, pad), (pad, pad)],
        dimension_numbers=("NCHW", "OIHW", "NCHW"),
        precision=lax.Precision.HIGHEST)
    return y + b[None, :, None, None]


def _reference(x, params):
    hid = _leaky(_torch_like_conv(x, params["w1"], params["b1"], 1, 1))
    main = _torch_like_conv(hid, params["w2"], params["b2"], 2, 1)
    side = _torch_like_conv(x, params["w3"], params["b3"], 2, 1)
    return _leaky(main + side)


if __name__ == "__main__":
    key = jax.random.PRNGKey(0)
    kx, kp = jax.random.split(key)

    N, in_c, H, W = 2, 4, 16, 16
    out_c = 8
    hid_c = in_c  # downResBlock_3x3 default: hid_c = in_c

    x = jax.random.normal(kx, (N, in_c, H, W), jnp.float32)
    params = init_params(kp, in_c, out_c, hid_c)

    fwd = jax.jit(down_res_block_3x3_forward)
    y = jax.block_until_ready(fwd(x, params))
    assert y.shape == (N, out_c, H // 2, W // 2), y.shape

    # Reference is f32 / Precision.HIGHEST; kernel path is bf16 data with f32
    # accumulation, so tolerance is loosened accordingly.
    y_ref = _reference(x, params)
    np.testing.assert_allclose(np.asarray(y), np.asarray(y_ref), rtol=4e-2, atol=4e-2)

    print("KERNEL_OK")
</pallas_src>

<mosaic_0001>
module attributes {stable_mosaic.version = 11 : i64} {
  func.func @_fused_down_res_kernel(%arg0: i32, %arg1: memref<1x4x384xbf16, #tpu.memory_space<vmem>>, %arg2: memref<9x4x4xbf16, #tpu.memory_space<vmem>>, %arg3: memref<16x8x8xbf16, #tpu.memory_space<vmem>>, %arg4: memref<4x1xf32, #tpu.memory_space<vmem>>, %arg5: memref<8x1xf32, #tpu.memory_space<vmem>>, %arg6: memref<1x384xf32, #tpu.memory_space<vmem>>, %arg7: memref<1x64xi32, #tpu.memory_space<vmem>>, %arg8: memref<1x8x64xf32, #tpu.memory_space<vmem>>, %arg9: memref<8x384xf32, #tpu.memory_space<vmem>>) attributes {dimension_semantics = [#tpu.dimension_semantics<parallel>], iteration_bounds = array<i64: 2>, scalar_prefetch = 0 : i64, scratch_operands = 1 : i64, tpu.core_type = #tpu.core_type<tc>, window_params = [{transform_indices = @transform_0, window_bounds = array<i64: 1, 4, 384>}, {pipeline_mode = #tpu.pipeline_mode<synchronous>, transform_indices = @transform_1, window_bounds = array<i64: 9, 4, 4>}, {pipeline_mode = #tpu.pipeline_mode<synchronous>, transform_indices = @transform_2, window_bounds = array<i64: 16, 8, 8>}, {pipeline_mode = #tpu.pipeline_mode<synchronous>, transform_indices = @transform_3, window_bounds = array<i64: 4, 1>}, {pipeline_mode = #tpu.pipeline_mode<synchronous>, transform_indices = @transform_4, window_bounds = array<i64: 8, 1>}, {pipeline_mode = #tpu.pipeline_mode<synchronous>, transform_indices = @transform_5, window_bounds = array<i64: 1, 384>}, {pipeline_mode = #tpu.pipeline_mode<synchronous>, transform_indices = @transform_6, window_bounds = array<i64: 1, 64>}, {transform_indices = @transform_7, window_bounds = array<i64: 1, 8, 64>}]} {
    %c0 = arith.constant 0 : index
    %c0_0 = arith.constant 0 : index
    %c0_1 = arith.constant 0 : index
    %0 = vector.load %arg1[%c0, %c0_0, %c0_1] : memref<1x4x384xbf16, #tpu.memory_space<vmem>>, vector<1x4x384xbf16>
    %1 = vector.shape_cast %0 : vector<1x4x384xbf16> to vector<4x384xbf16>
    %cst = arith.constant 0.000000e+00 : f32
    %2 = vector.broadcast %cst : f32 to vector<4x288xf32>
    %c0_2 = arith.constant 0 : index
    %c0_3 = arith.constant 0 : index
    %c0_4 = arith.constant 0 : index
    %3 = vector.load %arg2[%c0_2, %c0_3, %c0_4] : memref<9x4x4xbf16, #tpu.memory_space<vmem>>, vector<1x4x4xbf16>
    %4 = vector.shape_cast %3 : vector<1x4x4xbf16> to vector<4x4xbf16>
    %5 = vector.extract_strided_slice %1 {offsets = [0, 0], sizes = [4, 288], strides = [1, 1]} : vector<4x384xbf16> to vector<4x288xbf16>
    %cst_5 = arith.constant dense<0.000000e+00> : vector<4x288xf32>
    %6 = tpu.matmul %4, %5, %cst_5 {dimension_numbers = #tpu.dot_dimension_numbers<[1], [0], [0], [1], [0, 0, 1, 1], [], []>} : vector<4x4xbf16>, vector<4x288xbf16>, vector<4x288xf32> -> vector<4x288xf32>
    %7 = arith.addf %2, %6 : vector<4x288xf32>
    %c1 = arith.constant 1 : index
    %c0_6 = arith.constant 0 : index
    %c0_7 = arith.constant 0 : index
    %8 = vector.load %arg2[%c1, %c0_6, %c0_7] : memref<9x4x4xbf16, #tpu.memory_space<vmem>>, vector<1x4x4xbf16>
    %9 = vector.shape_cast %8 : vector<1x4x4xbf16> to vector<4x4xbf16>
    %10 = vector.extract_strided_slice %1 {offsets = [0, 1], sizes = [4, 288], strides = [1, 1]} : vector<4x384xbf16> to vector<4x288xbf16>
    %cst_8 = arith.constant dense<0.000000e+00> : vector<4x288xf32>
    %11 = tpu.matmul %9, %10, %cst_8 {dimension_numbers = #tpu.dot_dimension_numbers<[1], [0], [0], [1], [0, 0, 1, 1], [], []>} : vector<4x4xbf16>, vector<4x288xbf16>, vector<4x288xf32> -> vector<4x288xf32>
    %12 = arith.addf %7, %11 : vector<4x288xf32>
    %c2 = arith.constant 2 : index
    %c0_9 = arith.constant 0 : index
    %c0_10 = arith.constant 0 : index
    %13 = vector.load %arg2[%c2, %c0_9, %c0_10] : memref<9x4x4xbf16, #tpu.memory_space<vmem>>, vector<1x4x4xbf16>
    %14 = vector.shape_cast %13 : vector<1x4x4xbf16> to vector<4x4xbf16>
    %15 = vector.extract_strided_slice %1 {offsets = [0, 2], sizes = [4, 288], strides = [1, 1]} : vector<4x384xbf16> to vector<4x288xbf16>
    %cst_11 = arith.constant dense<0.000000e+00> : vector<4x288xf32>
    %16 = tpu.matmul %14, %15, %cst_11 {dimension_numbers = #tpu.dot_dimension_numbers<[1], [0], [0], [1], [0, 0, 1, 1], [], []>} : vector<4x4xbf16>, vector<4x288xbf16>, vector<4x288xf32> -> vector<4x288xf32>
    %17 = arith.addf %12, %16 : vector<4x288xf32>
    %c3 = arith.constant 3 : index
    %c0_12 = arith.constant 0 : index
    %c0_13 = arith.constant 0 : index
    %18 = vector.load %arg2[%c3, %c0_12, %c0_13] : memref<9x4x4xbf16, #tpu.memory_space<vmem>>, vector<1x4x4xbf16>
    %19 = vector.shape_cast %18 : vector<1x4x4xbf16> to vector<4x4xbf16>
    %20 = vector.extract_strided_slice %1 {offsets = [0, 18], sizes = [4, 288], strides = [1, 1]} : vector<4x384xbf16> to vector<4x288xbf16>
    %cst_14 = arith.constant dense<0.000000e+00> : vector<4x288xf32>
    %21 = tpu.matmul %19, %20, %cst_14 {dimension_numbers = #tpu.dot_dimension_numbers<[1], [0], [0], [1], [0, 0, 1, 1], [], []>} : vector<4x4xbf16>, vector<4x288xbf16>, vector<4x288xf32> -> vector<4x288xf32>
    %22 = arith.addf %17, %21 : vector<4x288xf32>
    %c4 = arith.constant 4 : index
    %c0_15 = arith.constant 0 : index
    %c0_16 = arith.constant 0 : index
    %23 = vector.load %arg2[%c4, %c0_15, %c0_16] : memref<9x4x4xbf16, #tpu.memory_space<vmem>>, vector<1x4x4xbf16>
    %24 = vector.shape_cast %23 : vector<1x4x4xbf16> to vector<4x4xbf16>
    %25 = vector.extract_strided_slice %1 {offsets = [0, 19], sizes = [4, 288], strides = [1, 1]} : vector<4x384xbf16> to vector<4x288xbf16>
    %cst_17 = arith.constant dense<0.000000e+00> : vector<4x288xf32>
    %26 = tpu.matmul %24, %25, %cst_17 {dimension_numbers = #tpu.dot_dimension_numbers<[1], [0], [0], [1], [0, 0, 1, 1], [], []>} : vector<4x4xbf16>, vector<4x288xbf16>, vector<4x288xf32> -> vector<4x288xf32>
    %27 = arith.addf %22, %26 : vector<4x288xf32>
    %c5 = arith.constant 5 : index
    %c0_18 = arith.constant 0 : index
    %c0_19 = arith.constant 0 : index
    %28 = vector.load %arg2[%c5, %c0_18, %c0_19] : memref<9x4x4xbf16, #tpu.memory_space<vmem>>, vector<1x4x4xbf16>
    %29 = vector.shape_cast %28 : vector<1x4x4xbf16> to vector<4x4xbf16>
    %30 = vector.extract_strided_slice %1 {offsets = [0, 20], sizes = [4, 288], strides = [1, 1]} : vector<4x384xbf16> to vector<4x288xbf16>
    %cst_20 = arith.constant dense<0.000000e+00> : vector<4x288xf32>
    %31 = tpu.matmul %29, %30, %cst_20 {dimension_numbers = #tpu.dot_dimension_numbers<[1], [0], [0], [1], [0, 0, 1, 1], [], []>} : vector<4x4xbf16>, vector<4x288xbf16>, vector<4x288xf32> -> vector<4x288xf32>
    %32 = arith.addf %27, %31 : vector<4x288xf32>
    %c6 = arith.constant 6 : index
    %c0_21 = arith.constant 0 : index
    %c0_22 = arith.constant 0 : index
    %33 = vector.load %arg2[%c6, %c0_21, %c0_22] : memref<9x4x4xbf16, #tpu.memory_space<vmem>>, vector<1x4x4xbf16>
    %34 = vector.shape_cast %33 : vector<1x4x4xbf16> to vector<4x4xbf16>
    %35 = vector.extract_strided_slice %1 {offsets = [0, 36], sizes = [4, 288], strides = [1, 1]} : vector<4x384xbf16> to vector<4x288xbf16>
    %cst_23 = arith.constant dense<0.000000e+00> : vector<4x288xf32>
    %36 = tpu.matmul %34, %35, %cst_23 {dimension_numbers = #tpu.dot_dimension_numbers<[1], [0], [0], [1], [0, 0, 1, 1], [], []>} : vector<4x4xbf16>, vector<4x288xbf16>, vector<4x288xf32> -> vector<4x288xf32>
    %37 = arith.addf %32, %36 : vector<4x288xf32>
    %c7 = arith.constant 7 : index
    %c0_24 = arith.constant 0 : index
    %c0_25 = arith.constant 0 : index
    %38 = vector.load %arg2[%c7, %c0_24, %c0_25] : memref<9x4x4xbf16, #tpu.memory_space<vmem>>, vector<1x4x4xbf16>
    %39 = vector.shape_cast %38 : vector<1x4x4xbf16> to vector<4x4xbf16>
    %40 = vector.extract_strided_slice %1 {offsets = [0, 37], sizes = [4, 288], strides = [1, 1]} : vector<4x384xbf16> to vector<4x288xbf16>
    %cst_26 = arith.constant dense<0.000000e+00> : vector<4x288xf32>
    %41 = tpu.matmul %39, %40, %cst_26 {dimension_numbers = #tpu.dot_dimension_numbers<[1], [0], [0], [1], [0, 0, 1, 1], [], []>} : vector<4x4xbf16>, vector<4x288xbf16>, vector<4x288xf32> -> vector<4x288xf32>
    %42 = arith.addf %37, %41 : vector<4x288xf32>
    %c8 = arith.constant 8 : index
    %c0_27 = arith.constant 0 : index
    %c0_28 = arith.constant 0 : index
    %43 = vector.load %arg2[%c8, %c0_27, %c0_28] : memref<9x4x4xbf16, #tpu.memory_space<vmem>>, vector<1x4x4xbf16>
    %44 = vector.shape_cast %43 : vector<1x4x4xbf16> to vector<4x4xbf16>
    %45 = vector.extract_strided_slice %1 {offsets = [0, 38], sizes = [4, 288], strides = [1, 1]} : vector<4x384xbf16> to vector<4x288xbf16>
    %cst_29 = arith.constant dense<0.000000e+00> : vector<4x288xf32>
    %46 = tpu.matmul %44, %45, %cst_29 {dimension_numbers = #tpu.dot_dimension_numbers<[1], [0], [0], [1], [0, 0, 1, 1], [], []>} : vector<4x4xbf16>, vector<4x288xbf16>, vector<4x288xf32> -> vector<4x288xf32>
    %47 = arith.addf %42, %46 : vector<4x288xf32>
    %c0_30 = arith.constant 0 : index
    %c0_31 = arith.constant 0 : index
    %48 = vector.load %arg4[%c0_30, %c0_31] : memref<4x1xf32, #tpu.memory_space<vmem>>, vector<4x1xf32>
    %49 = vector.broadcast %48 : vector<4x1xf32> to vector<4x288xf32>
    %50 = arith.addf %47, %49 : vector<4x288xf32>
    %cst_32 = arith.constant 0.000000e+00 : f32
    %51 = vector.broadcast %cst_32 : f32 to vector<4x288xf32>
    %52 = arith.cmpf ogt, %50, %51 : vector<4x288xf32>
    %cst_33 = arith.constant 0.00999999977 : f32
    %53 = vector.broadcast %cst_33 : f32 to vector<4x288xf32>
    %54 = arith.mulf %53, %50 : vector<4x288xf32>
    %55 = arith.select %52, %50, %54 : vector<4x288xi1>, vector<4x288xf32>
    %c0_34 = arith.constant 0 : index
    %c0_35 = arith.constant 0 : index
    %56 = vector.load %arg6[%c0_34, %c0_35] : memref<1x384xf32, #tpu.memory_space<vmem>>, vector<1x288xf32>
    %57 = vector.broadcast %56 : vector<1x288xf32> to vector<4x288xf32>
    %58 = arith.mulf %55, %57 : vector<4x288xf32>
    %cst_36 = arith.constant 0.000000e+00 : f32
    %59 = vector.broadcast %cst_36 : f32 to vector<4x19xf32>
    %cst_37 = arith.constant 0.000000e+00 : f32
    %60 = vector.broadcast %cst_37 : f32 to vector<4x77xf32>
    %61 = tpu.concatenate %59, %58, %60 in 1 : vector<4x19xf32>, vector<4x288xf32>, vector<4x77xf32> -> vector<4x384xf32>
    %c0_38 = arith.constant 0 : index
    %c0_39 = arith.constant 0 : index
    %62 = vector.load %arg9[%c0_38, %c0_39] : memref<8x384xf32, #tpu.memory_space<vmem>>, vector<4x384xf32>
    tpu.vector_store %arg9[%c0_38, %c0_39], %61 {strides = array<i32>} : memref<8x384xf32, #tpu.memory_space<vmem>>, vector<4x384xf32>,
    %63 = arith.extf %1 : vector<4x384xbf16> to vector<4x384xf32>
    %c4_40 = arith.constant 4 : index
    %c0_41 = arith.constant 0 : index
    %64 = vector.load %arg9[%c4_40, %c0_41] : memref<8x384xf32, #tpu.memory_space<vmem>>, vector<4x384xf32>
    tpu.vector_store %arg9[%c4_40, %c0_41], %63 {strides = array<i32>} : memref<8x384xf32, #tpu.memory_space<vmem>>, vector<4x384xf32>,
    %cst_42 = arith.constant 0.000000e+00 : f32
    %65 = vector.broadcast %cst_42 : f32 to vector<8x288xf32>
    %c0_43 = arith.constant 0 : index
    %c0_44 = arith.constant 0 : index
    %c0_45 = arith.constant 0 : index
    %66 = vector.load %arg3[%c0_43, %c0_44, %c0_45] : memref<16x8x8xbf16, #tpu.memory_space<vmem>>, vector<1x8x8xbf16>
    %67 = vector.shape_cast %66 : vector<1x8x8xbf16> to vector<8x8xbf16>
    %c0_46 = arith.constant 0 : index
    %c0_47 = arith.constant 0 : index
    %68 = vector.load %arg9[%c0_46, %c0_47] : memref<8x384xf32, #tpu.memory_space<vmem>>, vector<8x288xf32>
    %69 = arith.truncf %68 : vector<8x288xf32> to vector<8x288xbf16>
    %cst_48 = arith.constant dense<0.000000e+00> : vector<8x288xf32>
    %70 = tpu.matmul %67, %69, %cst_48 {dimension_numbers = #tpu.dot_dimension_numbers<[1], [0], [0], [1], [0, 0, 1, 1], [], []>} : vector<8x8xbf16>, vector<8x288xbf16>, vector<8x288xf32> -> vector<8x288xf32>
    %71 = arith.addf %65, %70 : vector<8x288xf32>
    %c1_49 = arith.constant 1 : index
    %c0_50 = arith.constant 0 : index
    %c0_51 = arith.constant 0 : index
    %72 = vector.load %arg3[%c1_49, %c0_50, %c0_51] : memref<16x8x8xbf16, #tpu.memory_space<vmem>>, vector<1x8x8xbf16>
    %73 = vector.shape_cast %72 : vector<1x8x8xbf16> to vector<8x8xbf16>
    %c0_52 = arith.constant 0 : index
    %c1_53 = arith.constant 1 : index
    %74 = vector.load %arg9[%c0_52, %c1_53] : memref<8x384xf32, #tpu.memory_space<vmem>>, vector<8x288xf32>
    %75 = arith.truncf %74 : vector<8x288xf32> to vector<8x288xbf16>
    %cst_54 = arith.constant dense<0.000000e+00> : vector<8x288xf32>
    %76 = tpu.matmul %73, %75, %cst_54 {dimension_numbers = #tpu.dot_dimension_numbers<[1], [0], [0], [1], [0, 0, 1, 1], [], []>} : vector<8x8xbf16>, vector<8x288xbf16>, vector<8x288xf32> -> vector<8x288xf32>
    %77 = arith.addf %71, %76 : vector<8x288xf32>
    %c2_55 = arith.constant 2 : index
    %c0_56 = arith.constant 0 : index
    %c0_57 = arith.constant 0 : index
    %78 = vector.load %arg3[%c2_55, %c0_56, %c0_57] : memref<16x8x8xbf16, #tpu.memory_space<vmem>>, vector<1x8x8xbf16>
    %79 = vector.shape_cast %78 : vector<1x8x8xbf16> to vector<8x8xbf16>
    %c0_58 = arith.constant 0 : index
    %c2_59 = arith.constant 2 : index
    %80 = vector.load %arg9[%c0_58, %c2_59] : memref<8x384xf32, #tpu.memory_space<vmem>>, vector<8x288xf32>
    %81 = arith.truncf %80 : vector<8x288xf32> to vector<8x288xbf16>
    %cst_60 = arith.constant dense<0.000000e+00> : vector<8x288xf32>
    %82 = tpu.matmul %79, %81, %cst_60 {dimension_numbers = #tpu.dot_dimension_numbers<[1], [0], [0], [1], [0, 0, 1, 1], [], []>} : vector<8x8xbf16>, vector<8x288xbf16>, vector<8x288xf32> -> vector<8x288xf32>
    %83 = arith.addf %77, %82 : vector<8x288xf32>
    %c3_61 = arith.constant 3 : index
    %c0_62 = arith.constant 0 : index
    %c0_63 = arith.constant 0 : index
    %84 = vector.load %arg3[%c3_61, %c0_62, %c0_63] : memref<16x8x8xbf16, #tpu.memory_space<vmem>>, vector<1x8x8xbf16>
    %85 = vector.shape_cast %84 : vector<1x8x8xbf16> to vector<8x8xbf16>
    %c0_64 = arith.constant 0 : index
    %c3_65 = arith.constant 3 : index
    %86 = vector.load %arg9[%c0_64, %c3_65] : memref<8x384xf32, #tpu.memory_space<vmem>>, vector<8x288xf32>
    %87 = arith.truncf %86 : vector<8x288xf32> to vector<8x288xbf16>
    %cst_66 = arith.constant dense<0.000000e+00> : vector<8x288xf32>
    %88 = tpu.matmul %85, %87, %cst_66 {dimension_numbers = #tpu.dot_dimension_numbers<[1], [0], [0], [1], [0, 0, 1, 1], [], []>} : vector<8x8xbf16>, vector<8x288xbf16>, vector<8x288xf32> -> vector<8x288xf32>
    %89 = arith.addf %83, %88 : vector<8x288xf32>
    %c4_67 = arith.constant 4 : index
    %c0_68 = arith.constant 0 : index
    %c0_69 = arith.constant 0 : index
    %90 = vector.load %arg3[%c4_67, %c0_68, %c0_69] : memref<16x8x8xbf16, #tpu.memory_space<vmem>>, vector<1x8x8xbf16>
    %91 = vector.shape_cast %90 : vector<1x8x8xbf16> to vector<8x8xbf16>
    %c0_70 = arith.constant 0 : index
    %c18 = arith.constant 18 : index
    %92 = vector.load %arg9[%c0_70, %c18] : memref<8x384xf32, #tpu.memory_space<vmem>>, vector<8x288xf32>
    %93 = arith.truncf %92 : vector<8x288xf32> to vector<8x288xbf16>
    %cst_71 = arith.constant dense<0.000000e+00> : vector<8x288xf32>
    %94 = tpu.matmul %91, %93, %cst_71 {dimension_numbers = #tpu.dot_dimension_numbers<[1], [0], [0], [1], [0, 0, 1, 1], [], []>} : vector<8x8xbf16>, vector<8x288xbf16>, vector<8x288xf32> -> vector<8x288xf32>
    %95 = arith.addf %89, %94 : vector<8x288xf32>
    %c5_72 = arith.constant 5 : index
    %c0_73 = arith.constant 0 : index
    %c0_74 = arith.constant 0 : index
    %96 = vector.load %arg3[%c5_72, %c0_73, %c0_74] : memref<16x8x8xbf16, #tpu.memory_space<vmem>>, vector<1x8x8xbf16>
    %97 = vector.shape_cast %96 : vector<1x8x8xbf16> to vector<8x8xbf16>
    %c0_75 = arith.constant 0 : index
    %c19 = arith.constant 19 : index
    %98 = vector.load %arg9[%c0_75, %c19] : memref<8x384xf32, #tpu.memory_space<vmem>>, vector<8x288xf32>
    %99 = arith.truncf %98 : vector<8x288xf32> to vector<8x288xbf16>
    %cst_76 = arith.constant dense<0.000000e+00> : vector<8x288xf32>
    %100 = tpu.matmul %97, %99, %cst_76 {dimension_numbers = #tpu.dot_dimension_numbers<[1], [0], [0], [1], [0, 0, 1, 1], [], []>} : vector<8x8xbf16>, vector<8x288xbf16>, vector<8x288xf32> -> vector<8x288xf32>
    %101 = arith.addf %95, %100 : vector<8x288xf32>
    %c6_77 = arith.constant 6 : index
    %c0_78 = arith.constant 0 : index
    %c0_79 = arith.constant 0 : index
    %102 = vector.load %arg3[%c6_77, %c0_78, %c0_79] : memref<16x8x8xbf16, #tpu.memory_space<vmem>>, vector<1x8x8xbf16>
    %103 = vector.shape_cast %102 : vector<1x8x8xbf16> to vector<8x8xbf16>
    %c0_80 = arith.constant 0 : index
    %c20 = arith.constant 20 : index
    %104 = vector.load %arg9[%c0_80, %c20] : memref<8x384xf32, #tpu.memory_space<vmem>>, vector<8x288xf32>
    %105 = arith.truncf %104 : vector<8x288xf32> to vector<8x288xbf16>
    %cst_81 = arith.constant dense<0.000000e+00> : vector<8x288xf32>
    %106 = tpu.matmul %103, %105, %cst_81 {dimension_numbers = #tpu.dot_dimension_numbers<[1], [0], [0], [1], [0, 0, 1, 1], [], []>} : vector<8x8xbf16>, vector<8x288xbf16>, vector<8x288xf32> -> vector<8x288xf32>
    %107 = arith.addf %101, %106 : vector<8x288xf32>
    %c7_82 = arith.constant 7 : index
    %c0_83 = arith.constant 0 : index
    %c0_84 = arith.constant 0 : index
    %108 = vector.load %arg3[%c7_82, %c0_83, %c0_84] : memref<16x8x8xbf16, #tpu.memory_space<vmem>>, vector<1x8x8xbf16>
    %109 = vector.shape_cast %108 : vector<1x8x8xbf16> to vector<8x8xbf16>
    %c0_85 = arith.constant 0 : index
    %c21 = arith.constant 21 : index
    %110 = vector.load %arg9[%c0_85, %c21] : memref<8x384xf32, #tpu.memory_space<vmem>>, vector<8x288xf32>
    %111 = arith.truncf %110 : vector<8x288xf32> to vector<8x288xbf16>
    %cst_86 = arith.constant dense<0.000000e+00> : vector<8x288xf32>
    %112 = tpu.matmul %109, %111, %cst_86 {dimension_numbers = #tpu.dot_dimension_numbers<[1], [0], [0], [1], [0, 0, 1, 1], [], []>} : vector<8x8xbf16>, vector<8x288xbf16>, vector<8x288xf32> -> vector<8x288xf32>
    %113 = arith.addf %107, %112 : vector<8x288xf32>
    %c8_87 = arith.constant 8 : index
    %c0_88 = arith.constant 0 : index
    %c0_89 = arith.constant 0 : index
    %114 = vector.load %arg3[%c8_87, %c0_88, %c0_89] : memref<16x8x8xbf16, #tpu.memory_space<vmem>>, vector<1x8x8xbf16>
    %115 = vector.shape_cast %114 : vector<1x8x8xbf16> to vector<8x8xbf16>
    %c0_90 = arith.constant 0 : index
    %c36 = arith.constant 36 : index
    %116 = vector.load %arg9[%c0_90, %c36] : memref<8x384xf32, #tpu.memory_space<vmem>>, vector<8x288xf32>
    %117 = arith.truncf %116 : vector<8x288xf32> to vector<8x288xbf16>
    %cst_91 = arith.constant dense<0.000000e+00> : vector<8x288xf32>
    %118 = tpu.matmul %115, %117, %cst_91 {dimension_numbers = #tpu.dot_dimension_numbers<[1], [0], [0], [1], [0, 0, 1, 1], [], []>} : vector<8x8xbf16>, vector<8x288xbf16>, vector<8x288xf32> -> vector<8x288xf32>
    %119 = arith.addf %113, %118 : vector<8x288xf32>
    %c9 = arith.constant 9 : index
    %c0_92 = arith.constant 0 : index
    %c0_93 = arith.constant 0 : index
    %120 = vector.load %arg3[%c9, %c0_92, %c0_93] : memref<16x8x8xbf16, #tpu.memory_space<vmem>>, vector<1x8x8xbf16>
    %121 = vector.shape_cast %120 : vector<1x8x8xbf16> to vector<8x8xbf16>
    %c0_94 = arith.constant 0 : index
    %c37 = arith.constant 37 : index
    %122 = vector.load %arg9[%c0_94, %c37] : memref<8x384xf32, #tpu.memory_space<vmem>>, vector<8x288xf32>
    %123 = arith.truncf %122 : vector<8x288xf32> to vector<8x288xbf16>
    %cst_95 = arith.constant dense<0.000000e+00> : vector<8x288xf32>
    %124 = tpu.matmul %121, %123, %cst_95 {dimension_numbers = #tpu.dot_dimension_numbers<[1], [0], [0], [1], [0, 0, 1, 1], [], []>} : vector<8x8xbf16>, vector<8x288xbf16>, vector<8x288xf32> -> vector<8x288xf32>
    %125 = arith.addf %119, %124 : vector<8x288xf32>
    %c10 = arith.constant 10 : index
    %c0_96 = arith.constant 0 : index
    %c0_97 = arith.constant 0 : index
    %126 = vector.load %arg3[%c10, %c0_96, %c0_97] : memref<16x8x8xbf16, #tpu.memory_space<vmem>>, vector<1x8x8xbf16>
    %127 = vector.shape_cast %126 : vector<1x8x8xbf16> to vector<8x8xbf16>
    %c0_98 = arith.constant 0 : index
    %c38 = arith.constant 38 : index
    %128 = vector.load %arg9[%c0_98, %c38] : memref<8x384xf32, #tpu.memory_space<vmem>>, vector<8x288xf32>
    %129 = arith.truncf %128 : vector<8x288xf32> to vector<8x288xbf16>
    %cst_99 = arith.constant dense<0.000000e+00> : vector<8x288xf32>
    %130 = tpu.matmul %127, %129, %cst_99 {dimension_numbers = #tpu.dot_dimension_numbers<[1], [0], [0], [1], [0, 0, 1, 1], [], []>} : vector<8x8xbf16>, vector<8x288xbf16>, vector<8x288xf32> -> vector<8x288xf32>
    %131 = arith.addf %125, %130 : vector<8x288xf32>
    %c11 = arith.constant 11 : index
    %c0_100 = arith.constant 0 : index
    %c0_101 = arith.constant 0 : index
    %132 = vector.load %arg3[%c11, %c0_100, %c0_101] : memref<16x8x8xbf16, #tpu.memory_space<vmem>>, vector<1x8x8xbf16>
    %133 = vector.shape_cast %132 : vector<1x8x8xbf16> to vector<8x8xbf16>
    %c0_102 = arith.constant 0 : index
    %c39 = arith.constant 39 : index
    %134 = vector.load %arg9[%c0_102, %c39] : memref<8x384xf32, #tpu.memory_space<vmem>>, vector<8x288xf32>
    %135 = arith.truncf %134 : vector<8x288xf32> to vector<8x288xbf16>
    %cst_103 = arith.constant dense<0.000000e+00> : vector<8x288xf32>
    %136 = tpu.matmul %133, %135, %cst_103 {dimension_numbers = #tpu.dot_dimension_numbers<[1], [0], [0], [1], [0, 0, 1, 1], [], []>} : vector<8x8xbf16>, vector<8x288xbf16>, vector<8x288xf32> -> vector<8x288xf32>
    %137 = arith.addf %131, %136 : vector<8x288xf32>
    %c12 = arith.constant 12 : index
    %c0_104 = arith.constant 0 : index
    %c0_105 = arith.constant 0 : index
    %138 = vector.load %arg3[%c12, %c0_104, %c0_105] : memref<16x8x8xbf16, #tpu.memory_space<vmem>>, vector<1x8x8xbf16>
    %139 = vector.shape_cast %138 : vector<1x8x8xbf16> to vector<8x8xbf16>
    %c0_106 = arith.constant 0 : index
    %c54 = arith.constant 54 : index
    %140 = vector.load %arg9[%c0_106, %c54] : memref<8x384xf32, #tpu.memory_space<vmem>>, vector<8x288xf32>
    %141 = arith.truncf %140 : vector<8x288xf32> to vector<8x288xbf16>
    %cst_107 = arith.constant dense<0.000000e+00> : vector<8x288xf32>
    %142 = tpu.matmul %139, %141, %cst_107 {dimension_numbers = #tpu.dot_dimension_numbers<[1], [0], [0], [1], [0, 0, 1, 1], [], []>} : vector<8x8xbf16>, vector<8x288xbf16>, vector<8x288xf32> -> vector<8x288xf32>
    %143 = arith.addf %137, %142 : vector<8x288xf32>
    %c13 = arith.constant 13 : index
    %c0_108 = arith.constant 0 : index
    %c0_109 = arith.constant 0 : index
    %144 = vector.load %arg3[%c13, %c0_108, %c0_109] : memref<16x8x8xbf16, #tpu.memory_space<vmem>>, vector<1x8x8xbf16>
    %145 = vector.shape_cast %144 : vector<1x8x8xbf16> to vector<8x8xbf16>
    %c0_110 = arith.constant 0 : index
    %c55 = arith.constant 55 : index
    %146 = vector.load %arg9[%c0_110, %c55] : memref<8x384xf32, #tpu.memory_space<vmem>>, vector<8x288xf32>
    %147 = arith.truncf %146 : vector<8x288xf32> to vector<8x288xbf16>
    %cst_111 = arith.constant dense<0.000000e+00> : vector<8x288xf32>
    %148 = tpu.matmul %145, %147, %cst_111 {dimension_numbers = #tpu.dot_dimension_numbers<[1], [0], [0], [1], [0, 0, 1, 1], [], []>} : vector<8x8xbf16>, vector<8x288xbf16>, vector<8x288xf32> -> vector<8x288xf32>
    %149 = arith.addf %143, %148 : vector<8x288xf32>
    %c14 = arith.constant 14 : index
    %c0_112 = arith.constant 0 : index
    %c0_113 = arith.constant 0 : index
    %150 = vector.load %arg3[%c14, %c0_112, %c0_113] : memref<16x8x8xbf16, #tpu.memory_space<vmem>>, vector<1x8x8xbf16>
    %151 = vector.shape_cast %150 : vector<1x8x8xbf16> to vector<8x8xbf16>
    %c0_114 = arith.constant 0 : index
    %c56 = arith.constant 56 : index
    %152 = vector.load %arg9[%c0_114, %c56] : memref<8x384xf32, #tpu.memory_space<vmem>>, vector<8x288xf32>
    %153 = arith.truncf %152 : vector<8x288xf32> to vector<8x288xbf16>
    %cst_115 = arith.constant dense<0.000000e+00> : vector<8x288xf32>
    %154 = tpu.matmul %151, %153, %cst_115 {dimension_numbers = #tpu.dot_dimension_numbers<[1], [0], [0], [1], [0, 0, 1, 1], [], []>} : vector<8x8xbf16>, vector<8x288xbf16>, vector<8x288xf32> -> vector<8x288xf32>
    %155 = arith.addf %149, %154 : vector<8x288xf32>
    %c15 = arith.constant 15 : index
    %c0_116 = arith.constant 0 : index
    %c0_117 = arith.constant 0 : index
    %156 = vector.load %arg3[%c15, %c0_116, %c0_117] : memref<16x8x8xbf16, #tpu.memory_space<vmem>>, vector<1x8x8xbf16>
    %157 = vector.shape_cast %156 : vector<1x8x8xbf16> to vector<8x8xbf16>
    %c0_118 = arith.constant 0 : index
    %c57 = arith.constant 57 : index
    %158 = vector.load %arg9[%c0_118, %c57] : memref<8x384xf32, #tpu.memory_space<vmem>>, vector<8x288xf32>
    %159 = arith.truncf %158 : vector<8x288xf32> to vector<8x288xbf16>
    %cst_119 = arith.constant dense<0.000000e+00> : vector<8x288xf32>
    %160 = tpu.matmul %157, %159, %cst_119 {dimension_numbers = #tpu.dot_dimension_numbers<[1], [0], [0], [1], [0, 0, 1, 1], [], []>} : vector<8x8xbf16>, vector<8x288xbf16>, vector<8x288xf32> -> vector<8x288xf32>
    %161 = arith.addf %155, %160 : vector<8x288xf32>
    %162 = tpu.iota {dimensions = array<i32: 0>} : vector<288x1xi32>
    %c0_120 = arith.constant 0 : index
    %c0_121 = arith.constant 0 : index
    %163 = vector.load %arg7[%c0_120, %c0_121] : memref<1x64xi32, #tpu.memory_space<vmem>>, vector<1x64xi32>
    %164 = vector.broadcast %162 : vector<288x1xi32> to vector<288x64xi32>
    %165 = vector.broadcast %163 : vector<1x64xi32> to vector<288x64xi32>
    %166 = arith.cmpi eq, %164, %165 : vector<288x64xi32>
    %167 = arith.extui %166 : vector<288x64xi1> to vector<288x64xi32>
    %168 = arith.sitofp %167 : vector<288x64xi32> to vector<288x64xf32>
    %cst_122 = arith.constant dense<0.000000e+00> : vector<8x64xf32>
    %169 = tpu.matmul %161, %168, %cst_122 {dimension_numbers = #tpu.dot_dimension_numbers<[1], [0], [0], [1], [0, 0, 1, 1], [], []>} : vector<8x288xf32>, vector<288x64xf32>, vector<8x64xf32> -> vector<8x64xf32>
    %c0_123 = arith.constant 0 : index
    %c0_124 = arith.constant 0 : index
    %170 = vector.load %arg5[%c0_123, %c0_124] : memref<8x1xf32, #tpu.memory_space<vmem>>, vector<8x1xf32>
    %171 = vector.broadcast %170 : vector<8x1xf32> to vector<8x64xf32>
    %172 = arith.addf %169, %171 : vector<8x64xf32>
    %cst_125 = arith.constant 0.000000e+00 : f32
    %173 = vector.broadcast %cst_125 : f32 to vector<8x64xf32>
    %174 = arith.cmpf ogt, %172, %173 : vector<8x64xf32>
    %cst_126 = arith.constant 0.00999999977 : f32
    %175 = vector.broadcast %cst_126 : f32 to vector<8x64xf32>
    %176 = arith.mulf %175, %172 : vector<8x64xf32>
    %177 = arith.select %174, %172, %176 : vector<8x64xi1>, vector<8x64xf32>
    %c0_127 = arith.constant 0 : index
    %c0_128 = arith.constant 0 : index
    %c0_129 = arith.constant 0 : index
    %178 = vector.load %arg8[%c0_127, %c0_128, %c0_129] : memref<1x8x64xf32, #tpu.memory_space<vmem>>, vector<1x8x64xf32>
    %179 = vector.shape_cast %178 : vector<1x8x64xf32> to vector<8x64xf32>
    %180 = vector.shape_cast %177 : vector<8x64xf32> to vector<1x8x64xf32>
    tpu.vector_store %arg8[%c0_127, %c0_128, %c0_129], %180 {strides = array<i32>} : memref<1x8x64xf32, #tpu.memory_space<vmem>>, vector<1x8x64xf32>,
    return
  }
  func.func @transform_0(%arg0: i32) -> (i32, i32, i32) {
    %c0_i32 = arith.constant 0 : i32
    %c0_i32_0 = arith.constant 0 : i32
    %c0_i32_1 = arith.constant 0 : i32
    return %arg0, %c0_i32, %c0_i32_0 : i32, i32, i32
  }
  func.func @transform_1(%arg0: i32) -> (i32, i32, i32) {
    %c0_i32 = arith.constant 0 : i32
    %c0_i32_0 = arith.constant 0 : i32
    %c0_i32_1 = arith.constant 0 : i32
    %c0_i32_2 = arith.constant 0 : i32
    return %c0_i32, %c0_i32_0, %c0_i32_1 : i32, i32, i32
  }
  func.func @transform_2(%arg0: i32) -> (i32, i32, i32) {
    %c0_i32 = arith.constant 0 : i32
    %c0_i32_0 = arith.constant 0 : i32
    %c0_i32_1 = arith.constant 0 : i32
    %c0_i32_2 = arith.constant 0 : i32
    return %c0_i32, %c0_i32_0, %c0_i32_1 : i32, i32, i32
  }
  func.func @transform_3(%arg0: i32) -> (i32, i32) {
    %c0_i32 = arith.constant 0 : i32
    %c0_i32_0 = arith.constant 0 : i32
    %c0_i32_1 = arith.constant 0 : i32
    return %c0_i32, %c0_i32_0 : i32, i32
  }
  func.func @transform_4(%arg0: i32) -> (i32, i32) {
    %c0_i32 = arith.constant 0 : i32
    %c0_i32_0 = arith.constant 0 : i32
    %c0_i32_1 = arith.constant 0 : i32
    return %c0_i32, %c0_i32_0 : i32, i32
  }
  func.func @transform_5(%arg0: i32) -> (i32, i32) {
    %c0_i32 = arith.constant 0 : i32
    %c0_i32_0 = arith.constant 0 : i32
    %c0_i32_1 = arith.constant 0 : i32
    return %c0_i32, %c0_i32_0 : i32, i32
  }
  func.func @transform_6(%arg0: i32) -> (i32, i32) {
    %c0_i32 = arith.constant 0 : i32
    %c0_i32_0 = arith.constant 0 : i32
    %c0_i32_1 = arith.constant 0 : i32
    return %c0_i32, %c0_i32_0 : i32, i32
  }
  func.func @transform_7(%arg0: i32) -> (i32, i32, i32) {
    %c0_i32 = arith.constant 0 : i32
    %c0_i32_0 = arith.constant 0 : i32
    %c0_i32_1 = arith.constant 0 : i32
    return %arg0, %c0_i32, %c0_i32_0 : i32, i32, i32
  }
}

</mosaic_0001>

<bundles_post_ra>
// kernel: down_res_block_3x3_forward.1
= control target key start
LH: loop header
LB: loop body
LE: loop exit
PB: predicated region body
PF: predicated region fallthrough
CT: control target
= control target key end

     0   :  { %s3905_s24 = smov 0   ;;  %s4547_s0 = inlined_call_operand.vmem [shape: bf16[2,4,384], index: 0, kind: input, shape index: {}]   ;;  %s4548_s1 = inlined_call_operand.vmem [shape: bf16[9,4,4], index: 1, kind: input, shape index: {}]   ;;  %s4549_s2 = inlined_call_operand.vmem [shape: bf16[16,8,8], index: 2, kind: input, shape index: {}]   ;;  %s4550_s3 = inlined_call_operand.vmem [shape: f32[4,1], index: 3, kind: input, shape index: {}]   ;;  %s4551_s4 = inlined_call_operand.vmem [shape: f32[8,1], index: 4, kind: input, shape index: {}]   ;;  %s4552_s5 = inlined_call_operand.vmem [shape: f32[1,384], index: 5, kind: input, shape index: {}]   ;;  %s4553_s6 = inlined_call_operand.vmem [shape: s32[1,64], index: 6, kind: input, shape index: {}]   ;;  %s4554_s7 = inlined_call_operand.vmem [shape: f32[2,8,64], index: 7, kind: output, shape index: {}]  }
   0x1 LB: > { %s3372_s25 = sadd.s32 4294967295, %s3842_s24   ;;  %p3376_p0 = scmp.ge.s32.totalorder %s3842_s24, 1  ;;  %s3842_s24 = sphi %s3905_s24, %s17_s24  }
   0x2   : > { %p237_p1 = scmp.lt.s32.totalorder %s3842_s24, 3 }
   0x4   : > { %p238_p2 = pnand %p3376_p0, %p237_p1 }
   0x5   : > { %p268_p3 = scmp.lt.s32.totalorder (!%p238_p2), %s3372_s25, 1  ;;  %s3846_s30 = smov (!%p238_p2), 127  }
   0x6   : > { %241 = sbr.rel (%p238_p2) target bundleno = 1188 (0x4a4), region = 48  ;;  %s3847_s10 = smov (!%p238_p2), 126  }
   0x7   : > { %s3848_s11 = smov (!%p238_p2), 110   ;;  %s3849_s12 = smov (!%p238_p2), 109  }
   0x8   : > { %s3850_s13 = smov (!%p238_p2), 108   ;;  %s3851_s14 = smov (!%p238_p2), 92  }
   0x9   : > { %s3852_s15 = smov (!%p238_p2), 91   ;;  %s3853_s16 = smov (!%p238_p2), 90  }
   0xa   : > { %s3857_s27 = smov (!%p238_p2), 125  }
   0xb   : > { %v287_v0 = vlaneseq  ;;  %v3844_v1 = vmov 1983009808   ;;  %s4556_s25 = smov (!%p268_p3, %s3372_s25), 1  ;;  %v3845_v5 = vmov 0   ;;  %vm312_vm0 = vcmask 1041408  }
   0xc   : > { %v285_v2 = vunpack.c.l.s4 %v3844_v1  ;;  %447 = vmatprep.mubr.bf16.mxu0 %v3845_v5  ;;  %354 = vmatprep.mubr.bf16.mxu1 %v3845_v5  ;;  %s3804_s26 = smul.u32 6, %s4556_s25  ;;  %v3935_v17 = vld [vmem:[%s4548_s1] sm:$0x3]  ;;  %vm308_vm1 = vcmask 31744   ;;  %vm305_vm2 = vcmask 1039360   ;;  %vm504_vm3 = vcmask 1031168  }
   0xd   : > { %v3915_v3 = vshrl.u32 %v287_v0, 7  ;;  %3834 = vset.pattern.permute.xlu0 %v3845_v5  ;;  %v1245_v18 = vld [vmem:[%s4550_s3] sm:$0xf]  ;;  %v3854_v28 = vmov 0.0   ;;  %vm3855_vm4 = vmmov 0   ;;  %vm611_vm5 = vcmask 900096  }
   0xe   : > { %v286_v4 = vunpack.c.0.s8 %v285_v2  ;;  %s272_s29 = scalar_lea.vmem %s4547_s0, %s3804_s26  ;;  %v3379_v26 = vld [vmem:[%s4548_s1 + $0x2] sm:$0x3]  ;;  %v3386_v35 = vld [vmem:[%s4548_s1 + $0x4] sm:$0x3]  ;;  %vm718_vm6 = vcmask 891904   ;;  %vm825_vm7 = vcmask 883712  }
   0xf   : > { %v278_v7 = vld [vmem:[%s272_s29] sm:$0x3f]  ;;  %v3390_v44 = vld [vmem:[%s4548_s1 + $0x6] sm:$0x3]  ;;  %v3394_v54 = vld [vmem:[%s4548_s1 + $0x8] sm:$0x3] }
  0x10   : > { %v289_v6 = vsub.s32 %v286_v4, %v3915_v3  ;;  %v1304_v9 = vunpack.c.l.bf16 %v278_v7  ;;  %v1305_v10 = vunpack.c.h.bf16 %v278_v7  ;;  %v283_v11 = vcombine.high %v278_v7, %v278_v7  ;;  %v3398_v0 = vld [vmem:[%s4548_s1 + $0xa] sm:$0x3]  ;;  %s3856_s26 = smov 19  }
  0x11   : > { %vm932_vm8 = vcmask 752640   ;;  %vm1039_vm9 = vcmask 744448   ;;  %vm1146_vm10 = vcmask 736256   ;;  %vm1292_vm14 = vcmask 154624  }
  0x12   : > { %v290_v8 = vrot.slane %v278_v7, %v289_v6  ;;  %v1308_v12 = vcombine.low %v1304_v9, %v1304_v9  ;;  %v1309_v13 = vcombine.low %v1305_v10, %v1305_v10  ;;  %1313 = vst [vmem:[#allocation2] sm:$0xf0] %v1304_v9  ;;  %v3926_v14 = vrot.slane %v283_v11, %v289_v6  ;;  %v3402_v11 = vld [vmem:[%s4548_s1 + $0xc] sm:$0x3] }
  0x13   : > { %vm1299_vm15 = vcmask 416768  }
  0x14   : > { %299 = vrot.lane.b32.xlu0 %v290_v8, %s3846_s30  ;;  %v298_v15 = vcombine.high %v290_v8, %v290_v8  ;;  %v407_v16 = vsel %vm312_vm0, %v290_v8, 0  ;;  %1312 = vst [vmem:[#allocation2 + $0x10] sm:$0xf0] %v1308_v12  ;;  %1314 = vst [vmem:[#allocation2 + $0x8] sm:$0xf0] %v1309_v13  ;;  %303 = vrot.lane.b32.xlu1 %v3926_v14, %s3846_s30  ;;  %v413_v40 = vsel %vm312_vm0, %v3926_v14, 0 }
  0x16   : > { %3383 = vmatprep.subr.msk.bf16.mxu0 %vm312_vm0, %v298_v15 }
  0x17   : > { %430 = vmatpush1.bf16.msra.mxu0 %v407_v16 }
  0x18   : > { %301 = vrot.lane.b32.xlu0 %v298_v15, %s3846_s30  ;;  %498 = vrot.lane.b32.xlu1 %v290_v8, %s3847_s10 }
  0x1a   : > { %3384 = vmatmul.mubr.msk.bf16.vlgmr.msra.gmra.mxu0 %vm308_vm1, %v3935_v17 }
  0x1b   : > { %551 = vmatprep.mubr.bf16.mxu0 %v3845_v5 }
  0x1c   : > { %500 = vrot.lane.b32.xlu0 %v298_v15, %s3847_s10  ;;  %502 = vrot.lane.b32.xlu1 %v3926_v14, %s3847_s10 }
  0x20   : > { %605 = vrot.lane.b32.xlu0 %v290_v8, %s3848_s11  ;;  %607 = vrot.lane.b32.xlu1 %v298_v15, %s3848_s11 }
  0x24   : > { %609 = vrot.lane.b32.xlu0 %v3926_v14, %s3848_s11  ;;  %712 = vrot.lane.b32.xlu1 %v290_v8, %s3849_s12 }
  0x28   : > { %714 = vrot.lane.b32.xlu0 %v298_v15, %s3849_s12  ;;  %716 = vrot.lane.b32.xlu1 %v3926_v14, %s3849_s12 }
  0x2c   : > { %819 = vrot.lane.b32.xlu0 %v290_v8, %s3850_s13  ;;  %821 = vrot.lane.b32.xlu1 %v298_v15, %s3850_s13 }
  0x30   : > { %823 = vrot.lane.b32.xlu0 %v3926_v14, %s3850_s13  ;;  %926 = vrot.lane.b32.xlu1 %v290_v8, %s3851_s14 }
  0x34   : > { %928 = vrot.lane.b32.xlu0 %v298_v15, %s3851_s14  ;;  %930 = vrot.lane.b32.xlu1 %v3926_v14, %s3851_s14 }
  0x38   : > { %1033 = vrot.lane.b32.xlu0 %v290_v8, %s3852_s15  ;;  %1035 = vrot.lane.b32.xlu1 %v298_v15, %s3852_s15 }
  0x3c   : > { %1037 = vrot.lane.b32.xlu0 %v3926_v14, %s3852_s15  ;;  %1140 = vrot.lane.b32.xlu1 %v290_v8, %s3853_s16 }
  0x40   : > { %1142 = vrot.lane.b32.xlu0 %v298_v15, %s3853_s16  ;;  %1144 = vrot.lane.b32.xlu1 %v3926_v14, %s3853_s16 }
  0x44   : > { %1248 = vperm.xlu0 %3834, %v1245_v18  }
  0x86   : > { %v300_v19 = vpop.permute.xlu0 %299  ;;  %v304_v20 = vpop.permute.xlu1 %303 }
  0x87   : > { %v320_v30 = vsel %vm312_vm0, %v304_v20, 0 }
  0x8a   : > { %v302_v21 = vpop.permute.xlu0 %301  ;;  %v499_v24 = vpop.permute.xlu1 %498 }
  0x8b   : > { %v307_v22 = vsel %vm305_vm2, %v302_v21, %v304_v20  ;;  %v306_v23 = vsel %vm305_vm2, %v300_v19, %v302_v21  ;;  %v3410_v20 = vld [vmem:[%s4548_s1 + $0x10] sm:$0x3] }
  0x8c   : > { %3380 = vmatprep.subr.msk.bf16.mxu1 %vm312_vm0, %v307_v22  ;;  %v314_v25 = vsel %vm312_vm0, %v306_v23, 0 }
  0x8d   : > { %337 = vmatpush1.bf16.msra.mxu1 %v314_v25 }
  0x8e   : > { %v501_v27 = vpop.permute.xlu0 %500  ;;  %3643 = vmatprep.subr.bf16.mxu1 %v3854_v28  ;;  %v503_v32 = vpop.permute.xlu1 %502 }
  0x8f   : > { %v505_v29 = vsel %vm504_vm3, %v499_v24, %v501_v27  ;;  %v506_v33 = vsel %vm504_vm3, %v501_v27, %v503_v32  ;;  %v517_v50 = vsel %vm312_vm0, %v503_v32, 0 }
  0x90   : > { %v511_v31 = vsel %vm312_vm0, %v505_v29, 0  ;;  %3381 = vmatmul.mubr.msk.bf16.vlgmr.msra.gmra.mxu1 %vm308_vm1, %v3379_v26  ;;  %3387 = vmatprep.subr.msk.bf16.mxu0 %vm312_vm0, %v506_v33 }
  0x91   : > { %3644 = vmatpush3.bf16.msra.mxu1 %v320_v30  ;;  %3645 = vmatprep.mubr.msk.bf16.mxu1 %vm3855_vm4, %v3854_v28 }
  0x92   : > { %v606_v34 = vpop.permute.xlu0 %605  ;;  %3649 = vmatprep.subr.bf16.mxu1 %v3854_v28  ;;  %534 = vmatpush1.bf16.msra.mxu0 %v511_v31  ;;  %v608_v36 = vpop.permute.xlu1 %607 }
  0x93   : > { %v612_v37 = vsel %vm611_vm5, %v606_v34, %v608_v36 }
  0x94   : > { %v618_v39 = vsel %vm312_vm0, %v612_v37, 0 }
  0x95   : > { %3388 = vmatmul.mubr.msk.bf16.vlgmr.msra.gmra.mxu0 %vm308_vm1, %v3386_v35 }
  0x96   : > { %v610_v38 = vpop.permute.xlu0 %609  ;;  %658 = vmatprep.mubr.bf16.mxu0 %v3845_v5  ;;  %v713_v42 = vpop.permute.xlu1 %712 }
  0x97   : > { %v613_v41 = vsel %vm611_vm5, %v608_v36, %v610_v38  ;;  %v624_v59 = vsel %vm312_vm0, %v610_v38, 0 }
  0x98   : > { %3646 = vmatmul.mubr.msk.bf16.vlgmr.msra.gmra.mxu1 %vm308_vm1, %v3379_v26  ;;  %3391 = vmatprep.subr.msk.bf16.mxu0 %vm312_vm0, %v613_v41 }
  0x99   : > { %641 = vmatpush1.bf16.msra.mxu0 %v618_v39  ;;  %3650 = vmatpush3.bf16.msra.mxu1 %v413_v40 }
  0x9a   : > { %3651 = vmatprep.mubr.msk.bf16.mxu1 %vm3855_vm4, %v3854_v28  ;;  %3655 = vmatprep.subr.bf16.mxu1 %v3854_v28  ;;  %v715_v43 = vpop.permute.xlu0 %714  ;;  %v717_v47 = vpop.permute.xlu1 %716 }
  0x9b   : > { %v719_v45 = vsel %vm718_vm6, %v713_v42, %v715_v43  ;;  %v720_v48 = vsel %vm718_vm6, %v715_v43, %v717_v47  ;;  %v731_v7 = vsel %vm312_vm0, %v717_v47, 0 }
  0x9c   : > { %v725_v46 = vsel %vm312_vm0, %v719_v45, 0  ;;  %3395 = vmatprep.subr.msk.bf16.mxu0 %vm312_vm0, %v720_v48 }
  0x9d   : > { %3392 = vmatmul.mubr.msk.bf16.vlgmr.msra.gmra.mxu0 %vm308_vm1, %v3390_v44 }
  0x9e   : > { %v820_v49 = vpop.permute.xlu0 %819  ;;  %748 = vmatpush1.bf16.msra.mxu0 %v725_v46  ;;  %765 = vmatprep.mubr.bf16.mxu0 %v3845_v5  ;;  %v822_v51 = vpop.permute.xlu1 %821 }
  0x9f   : > { %v826_v52 = vsel %vm825_vm7, %v820_v49, %v822_v51 }
  0xa0   : > { %3652 = vmatmul.mubr.msk.bf16.vlgmr.msra.gmra.mxu1 %vm308_vm1, %v3935_v17  ;;  %v832_v56 = vsel %vm312_vm0, %v826_v52, 0  ;;  %v3406_v17 = vld [vmem:[%s4548_s1 + $0xe] sm:$0x3] }
  0xa1   : > { %3656 = vmatpush3.bf16.msra.mxu1 %v517_v50  ;;  %3657 = vmatprep.mubr.msk.bf16.mxu1 %vm3855_vm4, %v3854_v28 }
  0xa2   : > { %3661 = vmatprep.subr.bf16.mxu1 %v3854_v28  ;;  %v824_v53 = vpop.permute.xlu0 %823  ;;  %v927_v57 = vpop.permute.xlu1 %926 }
  0xa3   : > { %v827_v55 = vsel %vm825_vm7, %v822_v51, %v824_v53  ;;  %v838_v15 = vsel %vm312_vm0, %v824_v53, 0 }
  0xa4   : > { %3399 = vmatprep.subr.msk.bf16.mxu0 %vm312_vm0, %v827_v55 }
  0xa5   : > { %3396 = vmatmul.mubr.msk.bf16.vlgmr.msra.gmra.mxu0 %vm308_vm1, %v3394_v54 }
  0xa6   : > { %v929_v58 = vpop.permute.xlu0 %928  ;;  %855 = vmatpush1.bf16.msra.mxu0 %v832_v56  ;;  %872 = vmatprep.mubr.bf16.mxu0 %v3845_v5  ;;  %v931_v60 = vpop.permute.xlu1 %930 }
  0xa7   : > { %v933_v61 = vsel %vm932_vm8, %v927_v57, %v929_v58  ;;  %v934_v62 = vsel %vm932_vm8, %v929_v58, %v931_v60  ;;  %v945_v19 = vsel %vm312_vm0, %v931_v60, 0 }
  0xa8   : > { %3658 = vmatmul.mubr.msk.bf16.vlgmr.msra.gmra.mxu1 %vm308_vm1, %v3386_v35  ;;  %3403 = vmatprep.subr.msk.bf16.mxu0 %vm312_vm0, %v934_v62  ;;  %v939_v1 = vsel %vm312_vm0, %v933_v61, 0 }
  0xa9   : > { %3662 = vmatpush3.bf16.msra.mxu1 %v624_v59  ;;  %3663 = vmatprep.mubr.msk.bf16.mxu1 %vm3855_vm4, %v3854_v28 }
  0xaa   : > { %3667 = vmatprep.subr.bf16.mxu1 %v3854_v28  ;;  %v1034_v63 = vpop.permute.xlu0 %1033  ;;  %v1036_v2 = vpop.permute.xlu1 %1035 }
  0xab   : > { %v1040_v9 = vsel %vm1039_vm9, %v1034_v63, %v1036_v2 }
  0xac   : > { %v1046_v12 = vsel %vm312_vm0, %v1040_v9, 0 }
  0xad   : > { %3400 = vmatmul.mubr.msk.bf16.vlgmr.msra.gmra.mxu0 %vm308_vm1, %v3398_v0 }
  0xae   : > { %v1038_v4 = vpop.permute.xlu0 %1037  ;;  %962 = vmatpush1.bf16.msra.mxu0 %v939_v1  ;;  %979 = vmatprep.mubr.bf16.mxu0 %v3845_v5  ;;  %v1141_v8 = vpop.permute.xlu1 %1140 }
  0xaf   : > { %v1041_v6 = vsel %vm1039_vm9, %v1036_v2, %v1038_v4  ;;  %v1052_v21 = vsel %vm312_vm0, %v1038_v4, 0 }
  0xb0   : > { %3664 = vmatmul.mubr.msk.bf16.vlgmr.msra.gmra.mxu1 %vm308_vm1, %v3390_v44  ;;  %3407 = vmatprep.subr.msk.bf16.mxu0 %vm312_vm0, %v1041_v6 }
  0xb1   : > { %3668 = vmatpush3.bf16.msra.mxu1 %v731_v7  ;;  %3669 = vmatprep.mubr.msk.bf16.mxu1 %vm3855_vm4, %v3854_v28 }
  0xb2   : > { %3673 = vmatprep.subr.bf16.mxu1 %v3854_v28  ;;  %v1143_v10 = vpop.permute.xlu0 %1142  ;;  %v1145_v13 = vpop.permute.xlu1 %1144 }
  0xb3   : > { %v1148_v14 = vsel %vm1146_vm10, %v1143_v10, %v1145_v13  ;;  %v1147_v16 = vsel %vm1146_vm10, %v1141_v8, %v1143_v10  ;;  %v1159_v22 = vsel %vm312_vm0, %v1145_v13, 0 }
  0xb4   : > { %v1153_v18 = vsel %vm312_vm0, %v1147_v16, 0 }
  0xb5   : > { %3404 = vmatmul.mubr.msk.bf16.vlgmr.msra.gmra.mxu0 %vm308_vm1, %v3402_v11 }
  0xb6   : > { %1069 = vmatpush1.bf16.msra.mxu0 %v1046_v12  ;;  %1086 = vmatprep.mubr.bf16.mxu0 %v3845_v5 }
  0xb7   : > { %3411 = vmatprep.subr.msk.bf16.mxu0 %vm312_vm0, %v1148_v14  ;;  %vm1339_vm0 = vcmask 1043456  }
  0xb8   : > { %3670 = vmatmul.mubr.msk.bf16.vlgmr.msra.gmra.mxu1 %vm308_vm1, %v3394_v54 }
  0xb9   : > { %3674 = vmatpush3.bf16.msra.mxu1 %v838_v15  ;;  %3675 = vmatprep.mubr.msk.bf16.mxu1 %vm3855_vm4, %v3854_v28 }
  0xba   : > { %3679 = vmatprep.subr.bf16.mxu1 %v3854_v28 }
  0xbd   : > { %3408 = vmatmul.mubr.msk.bf16.vlgmr.msra.gmra.mxu0 %vm308_vm1, %v3406_v17 }
  0xbe   : > { %1176 = vmatpush1.bf16.msra.mxu0 %v1153_v18  ;;  %1193 = vmatprep.mubr.bf16.mxu0 %v3845_v5 }
  0xc0   : > { %3676 = vmatmul.mubr.msk.bf16.vlgmr.msra.gmra.mxu1 %vm308_vm1, %v3398_v0 }
  0xc1   : > { %3680 = vmatpush3.bf16.msra.mxu1 %v945_v19  ;;  %3681 = vmatprep.mubr.msk.bf16.mxu1 %vm3855_vm4, %v3854_v28 }
  0xc2   : > { %3685 = vmatprep.subr.bf16.mxu1 %v3854_v28 }
  0xc5   : > { %3412 = vmatmul.mubr.msk.bf16.vlgmr.msra.gmra.mxu0 %vm308_vm1, %v3410_v20 }
  0xc6   : > { %1381 = vmatprep.mubr.bf16.mxu0 %v3845_v5 }
  0xc8   : > { %3682 = vmatmul.mubr.msk.bf16.vlgmr.msra.gmra.mxu1 %vm308_vm1, %v3402_v11 }
  0xc9   : > { %3686 = vmatpush3.bf16.msra.mxu1 %v1052_v21  ;;  %3687 = vmatprep.mubr.msk.bf16.mxu1 %vm3855_vm4, %v3854_v28 }
  0xca   : > { %3691 = vmatprep.subr.bf16.mxu1 %v3854_v28 }
  0xd0   : > { %3688 = vmatmul.mubr.msk.bf16.vlgmr.msra.gmra.mxu1 %vm308_vm1, %v3406_v17 }
  0xd1   : > { %3692 = vmatpush3.bf16.msra.mxu1 %v1159_v22  ;;  %3693 = vmatprep.mubr.msk.bf16.mxu1 %vm3855_vm4, %v3854_v28 }
  0xd2   : > { %3697 = vmatprep.subr.bf16.mxu1 %v3854_v28 }
  0xd8   : > { %3694 = vmatmul.mubr.msk.bf16.vlgmr.msra.gmra.mxu1 %vm308_vm1, %v3410_v20  ;;  %vm1335_vm1 = vcmask 64512  }
  0xd9   : > { %3699 = vmatprep.mubr.msk.bf16.mxu1 %vm3855_vm4, %v3854_v28 }
  0xda   : > { %v449_v23 = vpop.f32.mrf.mxu0 }
  0xdc   : > { %v451_v24 = vpop.f32.mrf.mxu0 }
  0xde   : > { %v453_v25 = vpop.f32.mrf.mxu0 }
  0xe0   : > { %v454_v26 = vpop.f32.mrf.mxu0 }
 0x150   : > { %v356_v27 = vpop.f32.mrf.mxu1 }
 0x151   : > { %v450_v4 = vadd.f32 %v449_v23, %v356_v27 }
 0x152   : > { %v358_v29 = vpop.f32.mrf.mxu1 }
 0x153   : > { %v452_v8 = vadd.f32 %v451_v24, %v358_v29 }
 0x154   : > { %v360_v30 = vpop.f32.mrf.mxu1 }
 0x155   : > { %v553_v32 = vpop.f32.mrf.mxu0 }
 0x156   : > { %v361_v31 = vpop.f32.mrf.mxu1  ;;  %v600_v9 = vadd.f32 %v553_v32, %v450_v4 }
 0x157   : > { %v555_v34 = vpop.f32.mrf.mxu0  ;;  %v1249_v31 = vpop.permute.xlu0 %1248 }
 0x158   : > { %v4093_v33 = vpop.f32.mrf.mxu1  ;;  %v601_v12 = vadd.f32 %v555_v34, %v452_v8 }
 0x159   : > { %v557_v36 = vpop.f32.mrf.mxu0 }
 0x15a   : > { %v3647_v35 = vpop.f32.mrf.mxu1 }
 0x15b   : > { %v558_v38 = vpop.f32.mrf.mxu0  ;;  %v1267_v35 = vsub.s32 0, %v3915_v3 }
 0x15c   : > { %v400_v37 = vpop.f32.mrf.mxu1  ;;  %v1263_v38 = vld [vmem:[%s4552_s5] sm:$0x7] }
 0x15d   : > { %v660_v40 = vpop.f32.mrf.mxu0 }
 0x15e   : > { %v3648_v39 = vpop.f32.mrf.mxu1  ;;  %v707_v13 = vadd.f32 %v660_v40, %v600_v9  ;;  %v1275_v9 = vsub.s32 2, %v3915_v3 }
 0x15f   : > { %v662_v42 = vpop.f32.mrf.mxu0 }
 0x160   : > { %v4095_v41 = vpop.f32.mrf.mxu1  ;;  %v708_v16 = vadd.f32 %v662_v42, %v601_v12  ;;  %v1271_v42 = vsub.s32 1, %v3915_v3 }
 0x161   : > { %v664_v44 = vpop.f32.mrf.mxu0 }
 0x162   : > { %v3653_v43 = vpop.f32.mrf.mxu1 }
 0x163   : > { %v665_v46 = vpop.f32.mrf.mxu0 }
 0x164   : > { %v493_v45 = vpop.f32.mrf.mxu1  ;;  %v1268_v46 = vrot.slane %v1263_v38, %v1267_v35 }
 0x165   : > { %v767_v48 = vpop.f32.mrf.mxu0 }
 0x166   : > { %v3654_v47 = vpop.f32.mrf.mxu1  ;;  %v814_v17 = vadd.f32 %v767_v48, %v707_v13  ;;  %v491_v48 = vadd.f32 %v4095_v41, %v4093_v33  ;;  %v1276_v13 = vrot.slane %v1263_v38, %v1275_v9 }
 0x167   : > { %v769_v50 = vpop.f32.mrf.mxu0 }
 0x168   : > { %v4097_v49 = vpop.f32.mrf.mxu1  ;;  %v815_v20 = vadd.f32 %v769_v50, %v708_v16 }
 0x169   : > { %v771_v52 = vpop.f32.mrf.mxu0 }
 0x16a   : > { %v3659_v51 = vpop.f32.mrf.mxu1 }
 0x16b   : > { %v772_v54 = vpop.f32.mrf.mxu0 }
 0x16c   : > { %v597_v53 = vpop.f32.mrf.mxu1 }
 0x16d   : > { %v874_v56 = vpop.f32.mrf.mxu0  ;;  %v1272_v53 = vrot.slane %v1263_v38, %v1271_v42 }
 0x16e   : > { %v3660_v55 = vpop.f32.mrf.mxu1  ;;  %v921_v21 = vadd.f32 %v874_v56, %v814_v17 }
 0x16f   : > { %v876_v58 = vpop.f32.mrf.mxu0  ;;  %v602_v55 = vadd.f32 %v4097_v49, %v491_v48 }
 0x170   : > { %v4099_v57 = vpop.f32.mrf.mxu1  ;;  %v922_v26 = vadd.f32 %v876_v58, %v815_v20 }
 0x171   : > { %v878_v60 = vpop.f32.mrf.mxu0 }
 0x172   : > { %v3665_v59 = vpop.f32.mrf.mxu1 }
 0x173   : > { %v879_v62 = vpop.f32.mrf.mxu0 }
 0x174   : > { %v704_v61 = vpop.f32.mrf.mxu1 }
 0x175   : > { %v981_v0 = vpop.f32.mrf.mxu0  ;;  %v709_v61 = vadd.f32 %v4099_v57, %v602_v55 }
 0x176   : > { %v3666_v63 = vpop.f32.mrf.mxu1  ;;  %v1028_v23 = vadd.f32 %v981_v0, %v921_v21 }
 0x177   : > { %v983_v2 = vpop.f32.mrf.mxu0 }
 0x178   : > { %v808_v1 = vpop.f32.mrf.mxu1  ;;  %v1029_v24 = vadd.f32 %v983_v2, %v922_v26 }
 0x179   : > { %v985_v7 = vpop.f32.mrf.mxu0  ;;  %v816_v41 = vadd.f32 %v808_v1, %v709_v61 }
 0x17a   : > { %v3671_v6 = vpop.f32.mrf.mxu1 }
 0x17b   : > { %v986_v11 = vpop.f32.mrf.mxu0 }
 0x17c   : > { %v811_v10 = vpop.f32.mrf.mxu1 }
 0x17d   : > { %v1088_v15 = vpop.f32.mrf.mxu0 }
 0x17e   : > { %v3672_v14 = vpop.f32.mrf.mxu1  ;;  %v1135_v29 = vadd.f32 %v1088_v15, %v1028_v23 }
 0x17f   : > { %v1090_v19 = vpop.f32.mrf.mxu0 }
 0x180   : > { %v915_v18 = vpop.f32.mrf.mxu1  ;;  %v1136_v36 = vadd.f32 %v1090_v19, %v1029_v24 }
 0x181   : > { %v1092_v25 = vpop.f32.mrf.mxu0  ;;  %v923_v2 = vadd.f32 %v915_v18, %v816_v41 }
 0x182   : > { %v3677_v22 = vpop.f32.mrf.mxu1 }
 0x183   : > { %v1093_v30 = vpop.f32.mrf.mxu0 }
 0x184   : > { %v918_v27 = vpop.f32.mrf.mxu1 }
 0x185   : > { %v1195_v34 = vpop.f32.mrf.mxu0 }
 0x186   : > { %v3678_v32 = vpop.f32.mrf.mxu1  ;;  %v1242_v37 = vadd.f32 %v1195_v34, %v1135_v29 }
 0x187   : > { %v1197_v40 = vpop.f32.mrf.mxu0 }
 0x188   : > { %v1022_v39 = vpop.f32.mrf.mxu1  ;;  %v1251_v43 = vadd.f32 %v1249_v31, %v1242_v37  ;;  %v1243_v44 = vadd.f32 %v1197_v40, %v1136_v36 }
 0x189   : > { %v1199_v47 = vpop.f32.mrf.mxu0  ;;  %v1030_v6 = vadd.f32 %v1022_v39, %v923_v2 }
 0x18a   : > { %v3683_v45 = vpop.f32.mrf.mxu1  ;;  %v1257_v50 = vmul.f32 0.01, %v1251_v43  ;;  %v1252_v51 = vadd.f32 %v1249_v31, %v1243_v44  ;;  %vm1254_vm11 = vcmp.gt.f32.partialorder %v1251_v43, 0.0 }
 0x18b   : > { %v1200_v54 = vpop.f32.mrf.mxu0 }
 0x18c   : > { %v1025_v52 = vpop.f32.mrf.mxu1  ;;  %vm1255_vm12 = vcmp.gt.f32.partialorder %v1252_v51, 0.0  ;;  %v1258_v56 = vmul.f32 0.01, %v1252_v51  ;;  %v1260_v58 = vsel %vm1254_vm11, %v1251_v43, %v1257_v50  ;;  %v3414_v43 = vld [vmem:[%s4549_s2 + $0x4] sm:$0xf] }
 0x18d   : > { %v1280_v60 = vmul.f32 %v1268_v46, %v1260_v58  ;;  %v1315_v52 = vld [vmem:[%s4549_s2] sm:$0xf] }
 0x18e   : > { %v3684_v59 = vpop.f32.mrf.mxu1  ;;  %v1261_v62 = vsel %vm1255_vm12, %v1252_v51, %v1258_v56 }
 0x18f   : > { %1286 = vrot.lane.b32.xlu0 %v1280_v60, %s3856_s26  ;;  %v1281_v33 = vmul.f32 %v1272_v53, %v1261_v62  ;;  %v3421_v62 = vld [vmem:[%s4549_s2 + $0x8] sm:$0xf] }
 0x190   : > { %v1129_v63 = vpop.f32.mrf.mxu1 }
 0x191   : > { %1288 = vrot.lane.b32.xlu1 %v1281_v33, %s3856_s26  ;;  %v1137_v49 = vadd.f32 %v1129_v63, %v1030_v6 }
 0x192   : > { %v3689_v0 = vpop.f32.mrf.mxu1 }
 0x194   : > { %v1132_v4 = vpop.f32.mrf.mxu1 }
 0x196   : > { %v3690_v7 = vpop.f32.mrf.mxu1 }
 0x197   : > { %v3425_v7 = vld [vmem:[%s4549_s2 + $0xc] sm:$0xf] }
 0x198   : > { %v1236_v8 = vpop.f32.mrf.mxu1 }
 0x199   : > { %v1244_v10 = vadd.f32 %v1236_v8, %v1137_v49 }
 0x19a   : > { %v3695_v11 = vpop.f32.mrf.mxu1 }
 0x19b   : > { %v1253_v12 = vadd.f32 %v1249_v31, %v1244_v10  ;;  %v3164_v31 = vld [vmem:[%s4551_s4] sm:$0xff] }
 0x19c   : > { %v1239_v57 = vpop.f32.mrf.mxu1 }
 0x19d   : > { %vm1256_vm13 = vcmp.gt.f32.partialorder %v1253_v12, 0.0  ;;  %v1259_v14 = vmul.f32 0.01, %v1253_v12 }
 0x19e   : > { %v3696_v15 = vpop.f32.mrf.mxu1 }
 0x19f   : > { %v1262_v16 = vsel %vm1256_vm13, %v1253_v12, %v1259_v14 }
 0x1a0   : > { %v1282_v1 = vmul.f32 %v1276_v13, %v1262_v16  ;;  %v3429_v13 = vld [vmem:[%s4549_s2 + $0x10] sm:$0xf] }
 0x1a2   : > { %1290 = vrot.lane.b32.xlu1 %v1282_v1, %s3856_s26 }
 0x201   : > { %v1287_v17 = vpop.permute.xlu0 %1286 }
 0x202   : > { %v1298_v18 = vsel %vm1292_vm14, 0.0, %v1287_v17 }
 0x203   : > { %1301 = vst [vmem:[#allocation2 + $0x10] sm:$0xf] %v1298_v18  ;;  %v1289_v19 = vpop.permute.xlu1 %1288 }
 0x204   : > { %v1293_v20 = vsel %vm1292_vm14, %v1287_v17, %v1289_v19 }
 0x205   : > { %1302 = vst [vmem:[#allocation2] sm:$0xf] %v1293_v20 }
 0x20a   : > { %v1316_v21 = vld [vmem:[#allocation2 + $0x10] sm:$0xff] }
 0x20b   : > { %v4113_v22 = vpack.c.bf16 %v1316_v21, %v1316_v21  ;;  %v3433_v21 = vld [vmem:[%s4549_s2 + $0x14] sm:$0xf] }
 0x20c   : > { %v1317_v25 = vld [vmem:[#allocation2] sm:$0xff] }
 0x20d   : > { %v4115_v26 = vpack.c.bf16 %v1317_v25, %v1317_v25  ;;  %1327 = vrot.lane.b32.xlu1 %v4113_v22, %s3846_s30  ;;  %v1434_v47 = vsel %vm1339_vm0, %v4113_v22, 0 }
 0x20f   : > { %1329 = vrot.lane.b32.xlu0 %v4115_v26, %s3846_s30 }
 0x213   : > { %1525 = vrot.lane.b32.xlu0 %v4113_v22, %s3847_s10 }
 0x214   : > { %v1291_v23 = vpop.permute.xlu1 %1290 }
 0x215   : > { %v1294_v27 = vsel %vm1292_vm14, %v1289_v19, %v1291_v23 }
 0x216   : > { %v1300_v30 = vsel %vm1299_vm15, %v1294_v27, 0.0 }
 0x217   : > { %1303 = vst [vmem:[#allocation2 + $0x8] sm:$0xf] %v1300_v30 }
 0x21e   : > { %v1318_v24 = vld [vmem:[#allocation2 + $0x8] sm:$0xff] }
 0x21f   : > { %v4124_v29 = vpack.c.bf16 %v1318_v24, %v1318_v24  ;;  %v3437_v24 = vld [vmem:[%s4549_s2 + $0x18] sm:$0xf] }
 0x221   : > { %1529 = vrot.lane.b32.xlu0 %v4124_v29, %s3847_s10  ;;  %1331 = vrot.lane.b32.xlu1 %v4124_v29, %s3846_s30  ;;  %s3858_s30 = smov 107   ;;  %v1440_v46 = vsel %vm1339_vm0, %v4124_v29, 0 }
 0x225   : > { %1633 = vrot.lane.b32.xlu0 %v4115_v26, %s3857_s27  ;;  %1527 = vrot.lane.b32.xlu1 %v4115_v26, %s3847_s10  ;;  %s3859_s10 = smov 89  }
 0x229   : > { %1738 = vrot.lane.b32.xlu0 %v4113_v22, %s3848_s11  ;;  %1631 = vrot.lane.b32.xlu1 %v4113_v22, %s3857_s27 }
 0x22d   : > { %1742 = vrot.lane.b32.xlu0 %v4124_v29, %s3848_s11  ;;  %1635 = vrot.lane.b32.xlu1 %v4124_v29, %s3857_s27 }
 0x231   : > { %1846 = vrot.lane.b32.xlu0 %v4115_v26, %s3849_s12  ;;  %1740 = vrot.lane.b32.xlu1 %v4115_v26, %s3848_s11  ;;  %s3860_s11 = smov 74  }
 0x235   : > { %1950 = vrot.lane.b32.xlu0 %v4113_v22, %s3850_s13  ;;  %1844 = vrot.lane.b32.xlu1 %v4113_v22, %s3849_s12 }
 0x239   : > { %1954 = vrot.lane.b32.xlu0 %v4124_v29, %s3850_s13  ;;  %1848 = vrot.lane.b32.xlu1 %v4124_v29, %s3849_s12  ;;  %s3861_s12 = smov 73  }
 0x23d   : > { %2058 = vrot.lane.b32.xlu0 %v4115_v26, %s3858_s30  ;;  %1952 = vrot.lane.b32.xlu1 %v4115_v26, %s3850_s13  ;;  %s3862_s13 = smov 72  }
 0x241   : > { %2163 = vrot.lane.b32.xlu0 %v4113_v22, %s3851_s14  ;;  %2056 = vrot.lane.b32.xlu1 %v4113_v22, %s3858_s30 }
 0x245   : > { %2167 = vrot.lane.b32.xlu0 %v4124_v29, %s3851_s14  ;;  %2060 = vrot.lane.b32.xlu1 %v4124_v29, %s3858_s30  ;;  %s3378_s30 = sshll.u32 %s4556_s25, 3 }
 0x249   : > { %2271 = vrot.lane.b32.xlu0 %v4115_v26, %s3852_s15  ;;  %2165 = vrot.lane.b32.xlu1 %v4115_v26, %s3851_s14  ;;  %s3863_s14 = smov 71  }
 0x24d   : > { %2375 = vrot.lane.b32.xlu0 %v4113_v22, %s3853_s16  ;;  %2269 = vrot.lane.b32.xlu1 %v4113_v22, %s3852_s15 }
 0x251   : > { %2379 = vrot.lane.b32.xlu0 %v4124_v29, %s3853_s16  ;;  %2273 = vrot.lane.b32.xlu1 %v4124_v29, %s3852_s15 }
 0x255   : > { %2483 = vrot.lane.b32.xlu0 %v4115_v26, %s3859_s10  ;;  %2377 = vrot.lane.b32.xlu1 %v4115_v26, %s3853_s16 }
 0x259   : > { %2588 = vrot.lane.b32.xlu0 %v4113_v22, %s3860_s11  ;;  %2481 = vrot.lane.b32.xlu1 %v4113_v22, %s3859_s10 }
 0x25d   : > { %2592 = vrot.lane.b32.xlu0 %v4124_v29, %s3860_s11  ;;  %2485 = vrot.lane.b32.xlu1 %v4124_v29, %s3859_s10 }
 0x261   : > { %2697 = vrot.lane.b32.xlu0 %v4115_v26, %s3861_s12  ;;  %2590 = vrot.lane.b32.xlu1 %v4115_v26, %s3860_s11 }
 0x265   : > { %2802 = vrot.lane.b32.xlu0 %v4113_v22, %s3862_s13  ;;  %2695 = vrot.lane.b32.xlu1 %v4113_v22, %s3861_s12 }
 0x269   : > { %2806 = vrot.lane.b32.xlu0 %v4124_v29, %s3862_s13  ;;  %2699 = vrot.lane.b32.xlu1 %v4124_v29, %s3861_s12  ;;  %s276_s12 = scalar_lea.vmem %s4554_s7, %s3378_s30 }
 0x26d   : > { %2911 = vrot.lane.b32.xlu0 %v4115_v26, %s3863_s14  ;;  %2804 = vrot.lane.b32.xlu1 %v4115_v26, %s3862_s13 }
 0x271   : > { %3167 = vperm.xlu0 %3834, %v3164_v31   ;;  %2909 = vrot.lane.b32.xlu1 %v4113_v22, %s3863_s14 }
 0x275   : > { %2913 = vrot.lane.b32.xlu1 %v4124_v29, %s3863_s14 }
 0x27f   : > { %v1328_v34 = vpop.permute.xlu1 %1327 }
 0x281   : > { %v1330_v32 = vpop.permute.xlu0 %1329 }
 0x282   : > { %v1333_v36 = vsel %vm305_vm2, %v1328_v34, %v1330_v32 }
 0x283   : > { %v1341_v42 = vsel %vm1339_vm0, %v1333_v36, 0 }
 0x285   : > { %v1526_v35 = vpop.permute.xlu0 %1525 }
 0x293   : > { %v1530_v37 = vpop.permute.xlu0 %1529  ;;  %v1332_v38 = vpop.permute.xlu1 %1331 }
 0x294   : > { %v1334_v39 = vsel %vm305_vm2, %v1330_v32, %v1332_v38  ;;  %v1347_v40 = vsel %vm1339_vm0, %v1332_v38, 0  ;;  %vm1637_vm2 = vcmask 1022976   ;;  %v1543_v56 = vsel %vm1339_vm0, %v1530_v37, 0 }
 0x295   : > { %3415 = vmatprep.subr.msk.bf16.mxu0 %vm1339_vm0, %v1334_v39  ;;  %3698 = vmatpush3.bf16.msra.mxu1 %v1347_v40 }
 0x296   : > { %1364 = vmatpush1.bf16.msra.mxu0 %v1341_v42  ;;  %3703 = vmatprep.subr.bf16.mxu1 %v3854_v28 }
 0x297   : > { %v1634_v44 = vpop.permute.xlu0 %1633  ;;  %3418 = vmatprep.subr.msk.bf16.mxu0 %vm1339_vm0, %v4115_v26  ;;  %v1528_v45 = vpop.permute.xlu1 %1527 }
 0x298   : > { %3700 = vmatmul.mubr.msk.bf16.vlgmr.msra.gmra.mxu1 %vm1335_vm1, %v3414_v43  ;;  %v1532_v48 = vsel %vm504_vm3, %v1528_v45, %v1530_v37  ;;  %v1531_v53 = vsel %vm504_vm3, %v1526_v35, %v1528_v45  ;;  %vm2062_vm3 = vcmask 875520   ;;  %v3441_v37 = vld [vmem:[%s4549_s2 + $0x1c] sm:$0xf] }
 0x299   : > { %3416 = vmatmul.mubr.msk.bf16.vlgmr.msra.gmra.mxu0 %vm1335_vm1, %v3414_v43  ;;  %3704 = vmatpush3.bf16.msra.mxu1 %v1440_v46  ;;  %v1537_v59 = vsel %vm1339_vm0, %v1531_v53, 0 }
 0x29a   : > { %1457 = vmatpush1.bf16.msra.mxu0 %v1434_v47  ;;  %3705 = vmatprep.mubr.msk.bf16.mxu1 %vm3855_vm4, %v3854_v28  ;;  %v3445_v47 = vld [vmem:[%s4549_s2 + $0x20] sm:$0xf] }
 0x29b   : > { %v1739_v50 = vpop.permute.xlu0 %1738  ;;  %3422 = vmatprep.subr.msk.bf16.mxu0 %vm1339_vm0, %v1532_v48  ;;  %v1632_v51 = vpop.permute.xlu1 %1631  ;;  %3709 = vmatprep.subr.bf16.mxu1 %v3854_v28 }
 0x29c   : > { %1474 = vmatprep.mubr.bf16.mxu0 %v3845_v5  ;;  %v1638_v63 = vsel %vm1637_vm2, %v1632_v51, %v1634_v44 }
 0x29d   : > { %v1644_v0 = vsel %vm1339_vm0, %v1638_v63, 0  ;;  %v3453_v63 = vld [vmem:[%s4549_s2 + $0x28] sm:$0xf] }
 0x29f   : > { %v1743_v54 = vpop.permute.xlu0 %1742  ;;  %v1636_v55 = vpop.permute.xlu1 %1635 }
 0x2a0   : > { %v1639_v58 = vsel %vm1637_vm2, %v1634_v44, %v1636_v55  ;;  %3706 = vmatmul.mubr.msk.bf16.vlgmr.msra.gmra.mxu1 %vm1335_vm1, %v1315_v52  ;;  %v1650_v41 = vsel %vm1339_vm0, %v1636_v55, 0  ;;  %v1756_v9 = vsel %vm1339_vm0, %v1743_v54, 0  ;;  %v3449_v55 = vld [vmem:[%s4549_s2 + $0x24] sm:$0xf] }
 0x2a1   : > { %3710 = vmatpush3.bf16.msra.mxu1 %v1543_v56  ;;  %3419 = vmatmul.mubr.msk.bf16.vlgmr.msra.gmra.mxu0 %vm1335_vm1, %v1315_v52 }
 0x2a2   : > { %1560 = vmatpush1.bf16.msra.mxu0 %v1537_v59  ;;  %3711 = vmatprep.mubr.msk.bf16.mxu1 %vm3855_vm4, %v3854_v28 }
 0x2a3   : > { %3426 = vmatprep.subr.msk.bf16.mxu0 %vm1339_vm0, %v1639_v58  ;;  %v1741_v60 = vpop.permute.xlu1 %1740  ;;  %3715 = vmatprep.subr.bf16.mxu1 %v3854_v28  ;;  %v1847_v61 = vpop.permute.xlu0 %1846 }
 0x2a4   : > { %1577 = vmatprep.mubr.bf16.mxu0 %v3845_v5  ;;  %v1745_v2 = vsel %vm611_vm5, %v1741_v60, %v1743_v54  ;;  %v1744_v49 = vsel %vm611_vm5, %v1739_v50, %v1741_v60  ;;  %vm2487_vm5 = vcmask 728064  }
 0x2a5   : > { %v1750_v10 = vsel %vm1339_vm0, %v1744_v49, 0 }
 0x2a7   : > { %v1845_v33 = vpop.permute.xlu1 %1844  ;;  %v1951_v4 = vpop.permute.xlu0 %1950 }
 0x2a8   : > { %3712 = vmatmul.mubr.msk.bf16.vlgmr.msra.gmra.mxu1 %vm1335_vm1, %v3421_v62  ;;  %v1850_v14 = vsel %vm718_vm6, %v1845_v33, %v1847_v61 }
 0x2a9   : > { %3716 = vmatpush3.bf16.msra.mxu1 %v1650_v41  ;;  %3423 = vmatmul.mubr.msk.bf16.vlgmr.msra.gmra.mxu0 %vm1335_vm1, %v3421_v62  ;;  %v1856_v17 = vsel %vm1339_vm0, %v1850_v14, 0  ;;  %v3461_v14 = vld [vmem:[%s4549_s2 + $0x30] sm:$0xf] }
 0x2aa   : > { %1667 = vmatpush1.bf16.msra.mxu0 %v1644_v0  ;;  %3717 = vmatprep.mubr.msk.bf16.mxu1 %vm3855_vm4, %v3854_v28 }
 0x2ab   : > { %3430 = vmatprep.subr.msk.bf16.mxu0 %vm1339_vm0, %v1745_v2  ;;  %v1849_v6 = vpop.permute.xlu1 %1848  ;;  %3721 = vmatprep.subr.bf16.mxu1 %v3854_v28  ;;  %v1955_v11 = vpop.permute.xlu0 %1954 }
 0x2ac   : > { %1684 = vmatprep.mubr.bf16.mxu0 %v3845_v5  ;;  %v1851_v12 = vsel %vm718_vm6, %v1847_v61, %v1849_v6  ;;  %v1862_v1 = vsel %vm1339_vm0, %v1849_v6, 0  ;;  %v1968_v25 = vsel %vm1339_vm0, %v1955_v11, 0  ;;  %vm2594_vm6 = vcmask 605184  }
 0x2af   : > { %v1953_v8 = vpop.permute.xlu1 %1952  ;;  %v2059_v15 = vpop.permute.xlu0 %2058 }
 0x2b0   : > { %3718 = vmatmul.mubr.msk.bf16.vlgmr.msra.gmra.mxu1 %vm1335_vm1, %v3425_v7  ;;  %v1957_v18 = vsel %vm825_vm7, %v1953_v8, %v1955_v11  ;;  %v1956_v22 = vsel %vm825_vm7, %v1951_v4, %v1953_v8  ;;  %v3457_v8 = vld [vmem:[%s4549_s2 + $0x2c] sm:$0xf]  ;;  %vm2701_vm7 = vcmask 596992  }
 0x2b1   : > { %3722 = vmatpush3.bf16.msra.mxu1 %v1756_v9  ;;  %3427 = vmatmul.mubr.msk.bf16.vlgmr.msra.gmra.mxu0 %vm1335_vm1, %v3425_v7  ;;  %v1962_v26 = vsel %vm1339_vm0, %v1956_v22, 0 }
 0x2b2   : > { %1773 = vmatpush1.bf16.msra.mxu0 %v1750_v10  ;;  %3723 = vmatprep.mubr.msk.bf16.mxu1 %vm3855_vm4, %v3854_v28 }
 0x2b3   : > { %3434 = vmatprep.subr.msk.bf16.mxu0 %vm1339_vm0, %v1851_v12  ;;  %v2057_v57 = vpop.permute.xlu1 %2056  ;;  %3727 = vmatprep.subr.bf16.mxu1 %v3854_v28  ;;  %v2164_v19 = vpop.permute.xlu0 %2163 }
 0x2b4   : > { %1790 = vmatprep.mubr.bf16.mxu0 %v3845_v5  ;;  %v2063_v29 = vsel %vm2062_vm3, %v2057_v57, %v2059_v15 }
 0x2b5   : > { %v2069_v32 = vsel %vm1339_vm0, %v2063_v29, 0 }
 0x2b7   : > { %v2061_v16 = vpop.permute.xlu1 %2060  ;;  %v2168_v27 = vpop.permute.xlu0 %2167 }
 0x2b8   : > { %3724 = vmatmul.mubr.msk.bf16.vlgmr.msra.gmra.mxu1 %vm1335_vm1, %v3429_v13  ;;  %v2064_v23 = vsel %vm2062_vm3, %v2059_v15, %v2061_v16  ;;  %v2075_v31 = vsel %vm1339_vm0, %v2061_v16, 0  ;;  %v2181_v42 = vsel %vm1339_vm0, %v2168_v27, 0 }
 0x2b9   : > { %3728 = vmatpush3.bf16.msra.mxu1 %v1862_v1  ;;  %3431 = vmatmul.mubr.msk.bf16.vlgmr.msra.gmra.mxu0 %vm1335_vm1, %v3429_v13 }
 0x2ba   : > { %1879 = vmatpush1.bf16.msra.mxu0 %v1856_v17  ;;  %3729 = vmatprep.mubr.msk.bf16.mxu1 %vm3855_vm4, %v3854_v28 }
 0x2bb   : > { %3438 = vmatprep.subr.msk.bf16.mxu0 %vm1339_vm0, %v1957_v18  ;;  %3733 = vmatprep.subr.bf16.mxu1 %v3854_v28  ;;  %v2166_v20 = vpop.permute.xlu1 %2165  ;;  %v2272_v34 = vpop.permute.xlu0 %2271 }
 0x2bc   : > { %1896 = vmatprep.mubr.bf16.mxu0 %v3845_v5  ;;  %v2170_v36 = vsel %vm932_vm8, %v2166_v20, %v2168_v27  ;;  %v2169_v38 = vsel %vm932_vm8, %v2164_v19, %v2166_v20  ;;  %vm2808_vm8 = vcmask 588800   ;;  %v3465_v20 = vld [vmem:[%s4549_s2 + $0x34] sm:$0xf] }
 0x2bd   : > { %v2175_v43 = vsel %vm1339_vm0, %v2169_v38, 0  ;;  %v3029_v38 = vadd.s32 112, %v3915_v3 }
 0x2bf   : > { %v2270_v30 = vpop.permute.xlu1 %2269  ;;  %v2376_v39 = vpop.permute.xlu0 %2375 }
 0x2c0   : > { %3730 = vmatmul.mubr.msk.bf16.vlgmr.msra.gmra.mxu1 %vm1335_vm1, %v3433_v21  ;;  %v2275_v48 = vsel %vm1039_vm9, %v2270_v30, %v2272_v34  ;;  %v3469_v30 = vld [vmem:[%s4549_s2 + $0x38] sm:$0xf] }
 0x2c1   : > { %3734 = vmatpush3.bf16.msra.mxu1 %v1968_v25  ;;  %3435 = vmatmul.mubr.msk.bf16.vlgmr.msra.gmra.mxu0 %vm1335_vm1, %v3433_v21  ;;  %v2281_v51 = vsel %vm1339_vm0, %v2275_v48, 0  ;;  %v3040_v48 = vadd.s32 200, %v3915_v3 }
 0x2c2   : > { %1985 = vmatpush1.bf16.msra.mxu0 %v1962_v26  ;;  %3735 = vmatprep.mubr.msk.bf16.mxu1 %vm3855_vm4, %v3854_v28 }
 0x2c3   : > { %3442 = vmatprep.subr.msk.bf16.mxu0 %vm1339_vm0, %v2064_v23  ;;  %3739 = vmatprep.subr.bf16.mxu1 %v3854_v28  ;;  %v2274_v35 = vpop.permute.xlu1 %2273  ;;  %v2380_v45 = vpop.permute.xlu0 %2379 }
 0x2c4   : > { %2002 = vmatprep.mubr.bf16.mxu0 %v3845_v5  ;;  %v2276_v44 = vsel %vm1039_vm9, %v2272_v34, %v2274_v35  ;;  %v2287_v50 = vsel %vm1339_vm0, %v2274_v35, 0  ;;  %v2393_v58 = vsel %vm1339_vm0, %v2380_v45, 0  ;;  %vm2915_vm9 = vcmask 580608   ;;  %v4410_v35 = vld [vmem:[%s4553_s6] ss:$0 sm:$0xff] }
 0x2c5   : > { %v3046_v34 = vadd.s32 248, %v3915_v3  ;;  %vm3070_vm12 = vcmp.eq.s32.totalorder %v3029_v38, %v4410_v35 }
 0x2c7   : > { %v2378_v40 = vpop.permute.xlu1 %2377  ;;  %v2484_v53 = vpop.permute.xlu0 %2483 }
 0x2c8   : > { %3736 = vmatmul.mubr.msk.bf16.vlgmr.msra.gmra.mxu1 %vm1335_vm1, %v3437_v24  ;;  %v2382_v52 = vsel %vm1146_vm10, %v2378_v40, %v2380_v45  ;;  %v2381_v56 = vsel %vm1146_vm10, %v2376_v39, %v2378_v40  ;;  %vm3087_vm10 = vcmp.eq.s32.totalorder %v3046_v34, %v4410_v35  ;;  %v3044_v39 = vadd.s32 232, %v3915_v3 }
 0x2c9   : > { %3740 = vmatpush3.bf16.msra.mxu1 %v2075_v31  ;;  %3439 = vmatmul.mubr.msk.bf16.vlgmr.msra.gmra.mxu0 %vm1335_vm1, %v3437_v24  ;;  %v2387_v59 = vsel %vm1339_vm0, %v2381_v56, 0  ;;  %v3028_v40 = vadd.s32 104, %v3915_v3  ;;  %v3026_v45 = vadd.s32 88, %v3915_v3  ;;  %v3021_v56 = vadd.s32 48, %v3915_v3 }
 0x2ca   : > { %2092 = vmatpush1.bf16.msra.mxu0 %v2069_v32  ;;  %3741 = vmatprep.mubr.msk.bf16.mxu1 %vm3855_vm4, %v3854_v28  ;;  %v3473_v32 = vld [vmem:[%s4549_s2 + $0x3c] sm:$0xf]  ;;  %vm3085_vm13 = vcmp.eq.s32.totalorder %v3044_v39, %v4410_v35 }
 0x2cb   : > { %3446 = vmatprep.subr.msk.bf16.mxu0 %vm1339_vm0, %v2170_v36  ;;  %3745 = vmatprep.subr.bf16.mxu1 %v3854_v28  ;;  %v2482_v46 = vpop.permute.xlu1 %2481  ;;  %v2589_v60 = vpop.permute.xlu0 %2588  ;;  %v3045_v36 = vadd.s32 240, %v3915_v3  ;;  %vm3069_vm14 = vcmp.eq.s32.totalorder %v3028_v40, %v4410_v35  ;;  %vm3067_vm2 = vcmp.eq.s32.totalorder %v3026_v45, %v4410_v35 }
 0x2cc   : > { %2109 = vmatprep.mubr.bf16.mxu0 %v3845_v5  ;;  %v2488_v33 = vsel %vm2487_vm5, %v2482_v46, %v2484_v53  ;;  %v3041_v46 = vadd.s32 208, %v3915_v3 }
 0x2cd   : > { %v2494_v4 = vsel %vm1339_vm0, %v2488_v33, 0  ;;  %v3034_v33 = vadd.s32 152, %v3915_v3 }
 0x2ce   : > { %vm3082_vm3 = vcmp.eq.s32.totalorder %v3041_v46, %v4410_v35 }
 0x2cf   : > { %v2486_v54 = vpop.permute.xlu1 %2485  ;;  %v2593_v41 = vpop.permute.xlu0 %2592 }
 0x2d0   : > { %3742 = vmatmul.mubr.msk.bf16.vlgmr.msra.gmra.mxu1 %vm1335_vm1, %v3441_v37  ;;  %v2489_v62 = vsel %vm2487_vm5, %v2484_v53, %v2486_v54  ;;  %v2500_v2 = vsel %vm1339_vm0, %v2486_v54, 0  ;;  %v2607_v10 = vsel %vm1339_vm0, %v2593_v41, 0  ;;  %v3038_v53 = vadd.s32 184, %v3915_v3 }
 0x2d1   : > { %3746 = vmatpush3.bf16.msra.mxu1 %v2181_v42  ;;  %3443 = vmatmul.mubr.msk.bf16.vlgmr.msra.gmra.mxu0 %vm1335_vm1, %v3441_v37  ;;  %v3864_v37 = vmov 1.0   ;;  %v3043_v42 = vadd.s32 224, %v3915_v3  ;;  %v3022_v54 = vadd.s32 56, %v3915_v3 }
 0x2d2   : > { %2198 = vmatpush1.bf16.msra.mxu0 %v2175_v43  ;;  %3747 = vmatprep.mubr.msk.bf16.mxu1 %vm3855_vm4, %v3854_v28  ;;  %v3027_v43 = vadd.s32 96, %v3915_v3 }
 0x2d3   : > { %3450 = vmatprep.subr.msk.bf16.mxu0 %vm1339_vm0, %v2276_v44  ;;  %3751 = vmatprep.subr.bf16.mxu1 %v3854_v28  ;;  %v2591_v61 = vpop.permute.xlu1 %2590  ;;  %v2698_v7 = vpop.permute.xlu0 %2697  ;;  %vm3084_vm15 = vcmp.eq.s32.totalorder %v3043_v42, %v4410_v35  ;;  %v3042_v44 = vadd.s32 216, %v3915_v3 }
 0x2d4   : > { %2215 = vmatprep.mubr.bf16.mxu0 %v3845_v5  ;;  %v2596_v6 = vsel %vm2594_vm6, %v2591_v61, %v2593_v41  ;;  %v2595_v9 = vsel %vm2594_vm6, %v2589_v60, %v2591_v61  ;;  %vm3081_vm6 = vcmp.eq.s32.totalorder %v3040_v48, %v4410_v35  ;;  %v3050_v60 = vadd.s32 280, %v3915_v3 }
 0x2d5   : > { %v2601_v11 = vsel %vm1339_vm0, %v2595_v9, 0  ;;  %v3035_v61 = vadd.s32 160, %v3915_v3  ;;  %v3018_v41 = vadd.s32 24, %v3915_v3 }
 0x2d7   : > { %v2696_v0 = vpop.permute.xlu1 %2695  ;;  %v2803_v57 = vpop.permute.xlu0 %2802 }
 0x2d8   : > { %3748 = vmatmul.mubr.msk.bf16.vlgmr.msra.gmra.mxu1 %vm1335_vm1, %v3445_v47  ;;  %v2702_v15 = vsel %vm2701_vm7, %v2696_v0, %v2698_v7  ;;  %v3048_v0 = vadd.s32 264, %v3915_v3 }
 0x2d9   : > { %3752 = vmatpush3.bf16.msra.mxu1 %v2287_v50  ;;  %3447 = vmatmul.mubr.msk.bf16.vlgmr.msra.gmra.mxu0 %vm1335_vm1, %v3445_v47  ;;  %v2708_v1 = vsel %vm1339_vm0, %v2702_v15, 0  ;;  %v3025_v47 = vadd.s32 80, %v3915_v3  ;;  %v3024_v50 = vadd.s32 72, %v3915_v3 }
 0x2da   : > { %2304 = vmatpush1.bf16.msra.mxu0 %v2281_v51  ;;  %3753 = vmatprep.mubr.msk.bf16.mxu1 %vm3855_vm4, %v3854_v28  ;;  %v3039_v51 = vadd.s32 192, %v3915_v3 }
 0x2db   : > { %3454 = vmatprep.subr.msk.bf16.mxu0 %vm1339_vm0, %v2382_v52  ;;  %3757 = vmatprep.subr.bf16.mxu1 %v3854_v28  ;;  %v2700_v49 = vpop.permute.xlu1 %2699  ;;  %v2807_v17 = vpop.permute.xlu0 %2806  ;;  %vm3066_vm5 = vcmp.eq.s32.totalorder %v3025_v47, %v4410_v35  ;;  %v3023_v52 = vadd.s32 64, %v3915_v3 }
 0x2dc   : > { %2321 = vmatprep.mubr.bf16.mxu0 %v3845_v5  ;;  %v2703_v12 = vsel %vm2701_vm7, %v2698_v7, %v2700_v49  ;;  %v2714_v16 = vsel %vm1339_vm0, %v2700_v49, 0  ;;  %v2821_v25 = vsel %vm1339_vm0, %v2807_v17, 0  ;;  %vm3065_vm7 = vcmp.eq.s32.totalorder %v3024_v50, %v4410_v35 }
 0x2dd   : > { %v3032_v7 = vadd.s32 136, %v3915_v3  ;;  %v3016_v49 = vadd.s32 8, %v3915_v3 }
 0x2df   : > { %v2805_v13 = vpop.permute.xlu1 %2804  ;;  %v2912_v26 = vpop.permute.xlu0 %2911 }
 0x2e0   : > { %3754 = vmatmul.mubr.msk.bf16.vlgmr.msra.gmra.mxu1 %vm1335_vm1, %v3449_v55  ;;  %v2810_v19 = vsel %vm2808_vm8, %v2805_v13, %v2807_v17  ;;  %v2809_v21 = vsel %vm2808_vm8, %v2803_v57, %v2805_v13  ;;  %vm3080_vm8 = vcmp.eq.s32.totalorder %v3039_v51, %v4410_v35 }
 0x2e1   : > { %3758 = vmatpush3.bf16.msra.mxu1 %v2393_v58  ;;  %3451 = vmatmul.mubr.msk.bf16.vlgmr.msra.gmra.mxu0 %vm1335_vm1, %v3449_v55  ;;  %v2815_v23 = vsel %vm1339_vm0, %v2809_v21, 0  ;;  %v3037_v55 = vadd.s32 176, %v3915_v3  ;;  %v3036_v58 = vadd.s32 168, %v3915_v3 }
 0x2e2   : > { %2410 = vmatpush1.bf16.msra.mxu0 %v2387_v59  ;;  %3759 = vmatprep.mubr.msk.bf16.mxu1 %vm3855_vm4, %v3854_v28  ;;  %v3020_v59 = vadd.s32 40, %v3915_v3 }
 0x2e3   : > { %3458 = vmatprep.subr.msk.bf16.mxu0 %vm1339_vm0, %v2489_v62  ;;  %3763 = vmatprep.subr.bf16.mxu1 %v3854_v28  ;;  %v2910_v18 = vpop.permute.xlu1 %2909  ;;  %v3019_v62 = vadd.s32 32, %v3915_v3 }
 0x2e4   : > { %2427 = vmatprep.mubr.bf16.mxu0 %v3845_v5  ;;  %v2916_v24 = vsel %vm2915_vm9, %v2910_v18, %v2912_v26 }
 0x2e5   : > { %v2922_v31 = vsel %vm1339_vm0, %v2916_v24, 0 }
 0x2e7   : > { %v2914_v22 = vpop.permute.xlu1 %2913 }
 0x2e8   : > { %3760 = vmatmul.mubr.msk.bf16.vlgmr.msra.gmra.mxu1 %vm1335_vm1, %v3453_v63  ;;  %v2917_v27 = vsel %vm2915_vm9, %v2912_v26, %v2914_v22  ;;  %v2928_v29 = vsel %vm1339_vm0, %v2914_v22, 0  ;;  %vm3064_vm9 = vcmp.eq.s32.totalorder %v3023_v52, %v4410_v35 }
 0x2e9   : > { %3764 = vmatpush3.bf16.msra.mxu1 %v2500_v2  ;;  %3455 = vmatmul.mubr.msk.bf16.vlgmr.msra.gmra.mxu0 %vm1335_vm1, %v3453_v63  ;;  %v3049_v63 = vadd.s32 272, %v3915_v3  ;;  %v3033_v2 = vadd.s32 144, %v3915_v3 }
 0x2ea   : > { %2517 = vmatpush1.bf16.msra.mxu0 %v2494_v4  ;;  %3765 = vmatprep.mubr.msk.bf16.mxu1 %vm3855_vm4, %v3854_v28  ;;  %v3017_v4 = vadd.s32 16, %v3915_v3 }
 0x2eb   : > { %3462 = vmatprep.subr.msk.bf16.mxu0 %vm1339_vm0, %v2596_v6  ;;  %3769 = vmatprep.subr.bf16.mxu1 %v3854_v28  ;;  %v3047_v6 = vadd.s32 256, %v3915_v3 }
 0x2ec   : > { %2534 = vmatprep.mubr.bf16.mxu0 %v3845_v5 }
 0x2f0   : > { %3766 = vmatmul.mubr.msk.bf16.vlgmr.msra.gmra.mxu1 %vm1335_vm1, %v3457_v8 }
 0x2f1   : > { %3770 = vmatpush3.bf16.msra.mxu1 %v2607_v10  ;;  %3459 = vmatmul.mubr.msk.bf16.vlgmr.msra.gmra.mxu0 %vm1335_vm1, %v3457_v8  ;;  %v3031_v8 = vadd.s32 128, %v3915_v3 }
 0x2f2   : > { %2624 = vmatpush1.bf16.msra.mxu0 %v2601_v11  ;;  %3771 = vmatprep.mubr.msk.bf16.mxu1 %vm3855_vm4, %v3854_v28 }
 0x2f3   : > { %3466 = vmatprep.subr.msk.bf16.mxu0 %vm1339_vm0, %v2703_v12  ;;  %3775 = vmatprep.subr.bf16.mxu1 %v3854_v28 }
 0x2f4   : > { %2641 = vmatprep.mubr.bf16.mxu0 %v3845_v5 }
 0x2f8   : > { %3772 = vmatmul.mubr.msk.bf16.vlgmr.msra.gmra.mxu1 %vm1335_vm1, %v3461_v14 }
 0x2f9   : > { %3776 = vmatpush3.bf16.msra.mxu1 %v2714_v16  ;;  %3463 = vmatmul.mubr.msk.bf16.vlgmr.msra.gmra.mxu0 %vm1335_vm1, %v3461_v14 }
 0x2fa   : > { %2731 = vmatpush1.bf16.msra.mxu0 %v2708_v1  ;;  %3777 = vmatprep.mubr.msk.bf16.mxu1 %vm3855_vm4, %v3854_v28 }
 0x2fb   : > { %3470 = vmatprep.subr.msk.bf16.mxu0 %vm1339_vm0, %v2810_v19  ;;  %3781 = vmatprep.subr.bf16.mxu1 %v3854_v28 }
 0x2fc   : > { %2748 = vmatprep.mubr.bf16.mxu0 %v3845_v5 }
 0x300   : > { %3778 = vmatmul.mubr.msk.bf16.vlgmr.msra.gmra.mxu1 %vm1335_vm1, %v3465_v20 }
 0x301   : > { %3782 = vmatpush3.bf16.msra.mxu1 %v2821_v25  ;;  %3467 = vmatmul.mubr.msk.bf16.vlgmr.msra.gmra.mxu0 %vm1335_vm1, %v3465_v20 }
 0x302   : > { %2838 = vmatpush1.bf16.msra.mxu0 %v2815_v23  ;;  %3783 = vmatprep.mubr.msk.bf16.mxu1 %vm3855_vm4, %v3854_v28 }
 0x303   : > { %3474 = vmatprep.subr.msk.bf16.mxu0 %vm1339_vm0, %v2917_v27  ;;  %3787 = vmatprep.subr.bf16.mxu1 %v3854_v28  ;;  %vm3068_vm0 = vcmp.eq.s32.totalorder %v3027_v43, %v4410_v35 }
 0x304   : > { %2855 = vmatprep.mubr.bf16.mxu0 %v3845_v5 }
 0x308   : > { %3784 = vmatmul.mubr.msk.bf16.vlgmr.msra.gmra.mxu1 %vm1335_vm1, %v3469_v30 }
 0x309   : > { %3788 = vmatpush3.bf16.msra.mxu1 %v2928_v29  ;;  %3471 = vmatmul.mubr.msk.bf16.vlgmr.msra.gmra.mxu0 %vm1335_vm1, %v3469_v30 }
 0x30a   : > { %2945 = vmatpush1.bf16.msra.mxu0 %v2922_v31  ;;  %3789 = vmatprep.mubr.msk.bf16.mxu1 %vm3855_vm4, %v3854_v28 }
 0x30b   : > { %2962 = vmatprep.mubr.bf16.mxu0 %v3845_v5  ;;  %3793 = vmatprep.subr.mxu1 %v3854_v28  ;;  %v3030_v5 = vadd.s32 120, %v3915_v3 }
 0x30c   : > { %3603 = vmatprep.subr.msk.mxu0 %vm3087_vm10, %v3864_v37  ;;  %vm3079_vm10 = vcmp.eq.s32.totalorder %v3038_v53, %v4410_v35 }
 0x30d   : > { %vm3071_vm11 = vcmp.eq.s32.totalorder %v3030_v5, %v4410_v35 }
 0x310   : > { %3790 = vmatmul.mubr.msk.bf16.vlgmr.msra.gmra.mxu1 %vm1335_vm1, %v3473_v32 }
 0x311   : > { %3475 = vmatmul.mubr.msk.bf16.vlgmr.msra.gmra.mxu0 %vm1335_vm1, %v3473_v32  ;;  %3801 = vmatprep.mubr.msk.f32.mxu1 %vm3855_vm4, %v3854_v28  ;;  %vm3086_vm4 = vcmp.eq.s32.totalorder %v3045_v36, %v4410_v35  ;;  %vm3083_vm1 = vcmp.eq.s32.totalorder %v3042_v44, %v4410_v35 }
 0x312   : > { %3604 = vmatpush3.msk.msra.mxu0 %vm3071_vm11, %v3864_v37  ;;  %vm3063_vm11 = vcmp.eq.s32.totalorder %v3022_v54, %v4410_v35 }
 0x313   : > { %3605 = vmatprep.subr.msk.mxu0 %vm3086_vm4, %v3864_v37  ;;  %vm3078_vm4 = vcmp.eq.s32.totalorder %v3037_v55, %v4410_v35 }
 0x314   : > { %3606 = vmatpush3.msk.msra.mxu0 %vm3070_vm12, %v3864_v37  ;;  %vm3062_vm12 = vcmp.eq.s32.totalorder %v3021_v56, %v4410_v35 }
 0x315   : > { %3607 = vmatprep.subr.msk.mxu0 %vm3085_vm13, %v3864_v37  ;;  %vm3077_vm13 = vcmp.eq.s32.totalorder %v3036_v58, %v4410_v35 }
 0x316   : > { %3608 = vmatpush3.msk.msra.mxu0 %vm3069_vm14, %v3864_v37  ;;  %vm3061_vm14 = vcmp.eq.s32.totalorder %v3020_v59, %v4410_v35 }
 0x317   : > { %3609 = vmatprep.subr.msk.mxu0 %vm3084_vm15, %v3864_v37  ;;  %vm3091_vm15 = vcmp.eq.s32.totalorder %v3050_v60, %v4410_v35 }
 0x318   : > { %3610 = vmatpush3.msk.msra.mxu0 %vm3068_vm0, %v3864_v37  ;;  %3794 = vmatpush3.msk.msra.mxu1 %vm3091_vm15, %v3864_v37  ;;  %vm3076_vm0 = vcmp.eq.s32.totalorder %v3035_v61, %v4410_v35  ;;  %vm3317_vm15 = vcmask 523264  }
 0x319   : > { %3611 = vmatprep.subr.msk.mxu0 %vm3083_vm1, %v3864_v37  ;;  %3795 = vmatprep.subr.mxu1 %v3854_v28  ;;  %vm3060_vm1 = vcmp.eq.s32.totalorder %v3019_v62, %v4410_v35 }
 0x31a   : > { %3612 = vmatpush3.msk.msra.mxu0 %vm3067_vm2, %v3864_v37  ;;  %vm3090_vm2 = vcmp.eq.s32.totalorder %v3049_v63, %v4410_v35 }
 0x31b   : > { %3613 = vmatprep.subr.msk.mxu0 %vm3082_vm3, %v3864_v37  ;;  %3796 = vmatpush3.msk.msra.mxu1 %vm3090_vm2, %v3864_v37  ;;  %vm3075_vm3 = vcmp.eq.s32.totalorder %v3034_v33, %v4410_v35 }
 0x31c   : > { %3614 = vmatpush3.msk.msra.mxu0 %vm3066_vm5, %v3864_v37  ;;  %3797 = vmatprep.subr.mxu1 %v3854_v28  ;;  %vm3059_vm5 = vcmp.eq.s32.totalorder %v3018_v41, %v4410_v35 }
 0x31d   : > { %3615 = vmatprep.subr.msk.mxu0 %vm3081_vm6, %v3864_v37  ;;  %vm3089_vm6 = vcmp.eq.s32.totalorder %v3048_v0, %v4410_v35 }
 0x31e   : > { %3616 = vmatpush3.msk.msra.mxu0 %vm3065_vm7, %v3864_v37  ;;  %3798 = vmatpush3.msk.msra.mxu1 %vm3089_vm6, %v3864_v37  ;;  %vm3074_vm7 = vcmp.eq.s32.totalorder %v3033_v2, %v4410_v35 }
 0x31f   : > { %3617 = vmatprep.subr.msk.mxu0 %vm3080_vm8, %v3864_v37  ;;  %3799 = vmatprep.subr.mxu1 %v3854_v28  ;;  %vm3058_vm8 = vcmp.eq.s32.totalorder %v3017_v4, %v4410_v35 }
 0x320   : > { %3618 = vmatpush3.msk.msra.mxu0 %vm3064_vm9, %v3864_v37  ;;  %vm3088_vm9 = vcmp.eq.s32.totalorder %v3047_v6, %v4410_v35 }
 0x321   : > { %3619 = vmatprep.subr.msk.mxu0 %vm3079_vm10, %v3864_v37  ;;  %3800 = vmatpush3.msk.msra.mxu1 %vm3088_vm9, %v3864_v37  ;;  %vm3073_vm10 = vcmp.eq.s32.totalorder %v3032_v7, %v4410_v35 }
 0x322   : > { %3620 = vmatpush3.msk.msra.mxu0 %vm3063_vm11, %v3864_v37  ;;  %vm3057_vm11 = vcmp.eq.s32.totalorder %v3016_v49, %v4410_v35 }
 0x323   : > { %3621 = vmatprep.subr.msk.mxu0 %vm3078_vm4, %v3864_v37  ;;  %vm3072_vm4 = vcmp.eq.s32.totalorder %v3031_v8, %v4410_v35 }
 0x324   : > { %3622 = vmatpush3.msk.msra.mxu0 %vm3062_vm12, %v3864_v37  ;;  %vm3056_vm12 = vcmp.eq.s32.totalorder %v3915_v3, %v4410_v35 }
 0x325   : > { %3623 = vmatprep.subr.msk.mxu0 %vm3077_vm13, %v3864_v37  ;;  %vm3170_vm13 = vcmask 261120  }
 0x326   : > { %3624 = vmatpush3.msk.msra.mxu0 %vm3061_vm14, %v3864_v37 }
 0x327   : > { %3625 = vmatprep.subr.msk.mxu0 %vm3076_vm0, %v3864_v37 }
 0x328   : > { %3626 = vmatpush3.msk.msra.mxu0 %vm3060_vm1, %v3864_v37 }
 0x329   : > { %3627 = vmatprep.subr.msk.mxu0 %vm3075_vm3, %v3864_v37 }
 0x32a   : > { %3628 = vmatpush3.msk.msra.mxu0 %vm3059_vm5, %v3864_v37 }
 0x32b   : > { %3629 = vmatprep.subr.msk.mxu0 %vm3074_vm7, %v3864_v37 }
 0x32c   : > { %3630 = vmatpush3.msk.msra.mxu0 %vm3058_vm8, %v3864_v37 }
 0x32d   : > { %3631 = vmatprep.subr.msk.mxu0 %vm3073_vm10, %v3864_v37 }
 0x32e   : > { %3632 = vmatpush3.msk.msra.mxu0 %vm3057_vm11, %v3864_v37 }
 0x32f   : > { %3633 = vmatprep.subr.msk.mxu0 %vm3072_vm4, %v3864_v37 }
 0x330   : > { %3634 = vmatpush3.msk.msra.mxu0 %vm3056_vm12, %v3864_v37 }
 0x358   : > { %v1424_v28 = vpop.f32.mrf.mxu1 }
 0x359   : > { %v1383_v9 = vpop.f32.mrf.mxu0 }
 0x35a   : > { %v3701_v10 = vpop.f32.mrf.mxu1 }
 0x35b   : > { %v1385_v11 = vpop.f32.mrf.mxu0 }
 0x35c   : > { %v1427_v12 = vpop.f32.mrf.mxu1 }
 0x35d   : > { %v1387_v57 = vpop.f32.mrf.mxu0 }
 0x35e   : > { %v3702_v13 = vpop.f32.mrf.mxu1 }
 0x35f   : > { %v1388_v14 = vpop.f32.mrf.mxu0 }
 0x360   : > { %v1517_v15 = vpop.f32.mrf.mxu1 }
 0x361   : > { %v1518_v16 = vadd.f32 %v1517_v15, %v1424_v28  ;;  %v1476_v1 = vpop.f32.mrf.mxu0 }
 0x362   : > { %v1477_v17 = vadd.f32 %v1476_v1, %v1383_v9  ;;  %v3707_v18 = vpop.f32.mrf.mxu1 }
 0x363   : > { %v1478_v19 = vpop.f32.mrf.mxu0 }
 0x364   : > { %v1479_v20 = vadd.f32 %v1478_v19, %v1385_v11  ;;  %v1520_v3 = vpop.f32.mrf.mxu1 }
 0x365   : > { %v1480_v21 = vpop.f32.mrf.mxu0 }
 0x366   : > { %v3708_v22 = vpop.f32.mrf.mxu1 }
 0x367   : > { %v1481_v25 = vpop.f32.mrf.mxu0 }
 0x368   : > { %v1620_v26 = vpop.f32.mrf.mxu1 }
 0x369   : > { %v1628_v23 = vadd.f32 %v1620_v26, %v1518_v16  ;;  %v1579_v27 = vpop.f32.mrf.mxu0 }
 0x36a   : > { %v1626_v30 = vadd.f32 %v1579_v27, %v1477_v17  ;;  %v3713_v24 = vpop.f32.mrf.mxu1 }
 0x36b   : > { %v1581_v29 = vpop.f32.mrf.mxu0 }
 0x36c   : > { %v1627_v31 = vadd.f32 %v1581_v29, %v1479_v20  ;;  %v1623_v32 = vpop.f32.mrf.mxu1 }
 0x36d   : > { %v1583_v34 = vpop.f32.mrf.mxu0 }
 0x36e   : > { %v3714_v35 = vpop.f32.mrf.mxu1 }
 0x36f   : > { %v1584_v5 = vpop.f32.mrf.mxu0 }
 0x370   : > { %v1727_v36 = vpop.f32.mrf.mxu1 }
 0x371   : > { %v1735_v37 = vadd.f32 %v1727_v36, %v1628_v23  ;;  %v1686_v38 = vpop.f32.mrf.mxu0 }
 0x372   : > { %v1733_v39 = vadd.f32 %v1686_v38, %v1626_v30  ;;  %v3719_v40 = vpop.f32.mrf.mxu1 }
 0x373   : > { %v1688_v42 = vpop.f32.mrf.mxu0 }
 0x374   : > { %v1734_v43 = vadd.f32 %v1688_v42, %v1627_v31  ;;  %v1730_v44 = vpop.f32.mrf.mxu1 }
 0x375   : > { %v1690_v45 = vpop.f32.mrf.mxu0 }
 0x376   : > { %v3720_v46 = vpop.f32.mrf.mxu1 }
 0x377   : > { %v1691_v47 = vpop.f32.mrf.mxu0 }
 0x378   : > { %v1833_v48 = vpop.f32.mrf.mxu1 }
 0x379   : > { %v4522_v50 = vadd.f32 %v1833_v48, %v1735_v37  ;;  %v1792_v51 = vpop.f32.mrf.mxu0 }
 0x37a   : > { %v4524_v52 = vadd.f32 %v1792_v51, %v1733_v39  ;;  %v3725_v53 = vpop.f32.mrf.mxu1 }
 0x37b   : > { %v1794_v54 = vpop.f32.mrf.mxu0 }
 0x37c   : > { %v4526_v55 = vadd.f32 %v1794_v54, %v1734_v43  ;;  %v1836_v56 = vpop.f32.mrf.mxu1 }
 0x37d   : > { %v1796_v58 = vpop.f32.mrf.mxu0 }
 0x37e   : > { %v3726_v59 = vpop.f32.mrf.mxu1 }
 0x37f   : > { %v1797_v60 = vpop.f32.mrf.mxu0 }
 0x380   : > { %v1939_v61 = vpop.f32.mrf.mxu1 }
 0x381   : > { %v4528_v62 = vpop.f32.mrf.mxu0 }
 0x382   : > { %v3731_v63 = vpop.f32.mrf.mxu1 }
 0x383   : > { %v4530_v33 = vpop.f32.mrf.mxu0  ;;  %v1947_v63 = vadd.f32 %v1939_v61, %v4522_v50 }
 0x384   : > { %v1942_v41 = vpop.f32.mrf.mxu1 }
 0x385   : > { %v1902_v0 = vpop.f32.mrf.mxu0 }
 0x386   : > { %v3732_v2 = vpop.f32.mrf.mxu1 }
 0x387   : > { %v1903_v4 = vpop.f32.mrf.mxu0 }
 0x388   : > { %v2045_v6 = vpop.f32.mrf.mxu1 }
 0x389   : > { %v4532_v7 = vpop.f32.mrf.mxu0  ;;  %v2053_v2 = vadd.f32 %v2045_v6, %v1947_v63 }
 0x38a   : > { %v3737_v49 = vpop.f32.mrf.mxu1 }
 0x38b   : > { %v2006_v8 = vpop.f32.mrf.mxu0  ;;  %v1946_v49 = vadd.f32 %v4530_v33, %v4526_v55 }
 0x38c   : > { %v2048_v28 = vpop.f32.mrf.mxu1 }
 0x38d   : > { %v2008_v9 = vpop.f32.mrf.mxu0 }
 0x38e   : > { %v3738_v10 = vpop.f32.mrf.mxu1  ;;  %v1945_v9 = vadd.f32 %v4528_v62, %v4524_v52 }
 0x38f   : > { %v2009_v11 = vpop.f32.mrf.mxu0 }
 0x390   : > { %v2152_v12 = vpop.f32.mrf.mxu1 }
 0x391   : > { %v2111_v57 = vpop.f32.mrf.mxu0  ;;  %v2160_v10 = vadd.f32 %v2152_v12, %v2053_v2 }
 0x392   : > { %v3743_v13 = vpop.f32.mrf.mxu1 }
 0x393   : > { %v2113_v14 = vpop.f32.mrf.mxu0  ;;  %v2052_v13 = vadd.f32 %v2006_v8, %v1946_v49 }
 0x394   : > { %v2155_v15 = vpop.f32.mrf.mxu1 }
 0x395   : > { %v2115_v16 = vpop.f32.mrf.mxu0  ;;  %v2159_v50 = vadd.f32 %v2113_v14, %v2052_v13 }
 0x396   : > { %v3744_v1 = vpop.f32.mrf.mxu1  ;;  %v2051_v16 = vadd.f32 %v4532_v7, %v1945_v9 }
 0x397   : > { %v2116_v17 = vpop.f32.mrf.mxu0 }
 0x398   : > { %v2258_v18 = vpop.f32.mrf.mxu1 }
 0x399   : > { %v2217_v19 = vpop.f32.mrf.mxu0  ;;  %v2266_v1 = vadd.f32 %v2258_v18, %v2160_v10 }
 0x39a   : > { %v3749_v20 = vpop.f32.mrf.mxu1 }
 0x39b   : > { %v2219_v3 = vpop.f32.mrf.mxu0  ;;  %v2158_v20 = vadd.f32 %v2111_v57, %v2051_v16 }
 0x39c   : > { %v2261_v21 = vpop.f32.mrf.mxu1 }
 0x39d   : > { %v2221_v22 = vpop.f32.mrf.mxu0  ;;  %v2264_v55 = vadd.f32 %v2217_v19, %v2158_v20 }
 0x39e   : > { %v3750_v25 = vpop.f32.mrf.mxu1  ;;  %v2265_v22 = vadd.f32 %v2219_v3, %v2159_v50 }
 0x39f   : > { %v2222_v26 = vpop.f32.mrf.mxu0 }
 0x3a0   : > { %v2364_v23 = vpop.f32.mrf.mxu1 }
 0x3a1   : > { %v2323_v27 = vpop.f32.mrf.mxu0  ;;  %v2372_v6 = vadd.f32 %v2364_v23, %v2266_v1 }
 0x3a2   : > { %v3755_v30 = vpop.f32.mrf.mxu1  ;;  %v2370_v62 = vadd.f32 %v2323_v27, %v2264_v55 }
 0x3a3   : > { %v2325_v24 = vpop.f32.mrf.mxu0 }
 0x3a4   : > { %v2367_v29 = vpop.f32.mrf.mxu1  ;;  %v2371_v30 = vadd.f32 %v2325_v24, %v2265_v22 }
 0x3a5   : > { %v2327_v31 = vpop.f32.mrf.mxu0 }
 0x3a6   : > { %v3756_v32 = vpop.f32.mrf.mxu1 }
 0x3a7   : > { %v2328_v34 = vpop.f32.mrf.mxu0 }
 0x3a8   : > { %v2470_v35 = vpop.f32.mrf.mxu1 }
 0x3a9   : > { %v2429_v5 = vpop.f32.mrf.mxu0  ;;  %v2478_v33 = vadd.f32 %v2470_v35, %v2372_v6 }
 0x3aa   : > { %v3761_v36 = vpop.f32.mrf.mxu1  ;;  %v2476_v7 = vadd.f32 %v2429_v5, %v2370_v62 }
 0x3ab   : > { %v2431_v37 = vpop.f32.mrf.mxu0 }
 0x3ac   : > { %v2473_v38 = vpop.f32.mrf.mxu1  ;;  %v2477_v29 = vadd.f32 %v2431_v37, %v2371_v30 }
 0x3ad   : > { %v2433_v39 = vpop.f32.mrf.mxu0 }
 0x3ae   : > { %v3762_v40 = vpop.f32.mrf.mxu1 }
 0x3af   : > { %v2434_v42 = vpop.f32.mrf.mxu0 }
 0x3b0   : > { %v2577_v43 = vpop.f32.mrf.mxu1 }
 0x3b1   : > { %v2536_v44 = vpop.f32.mrf.mxu0  ;;  %v2585_v12 = vadd.f32 %v2577_v43, %v2478_v33 }
 0x3b2   : > { %v3767_v45 = vpop.f32.mrf.mxu1  ;;  %v2583_v57 = vadd.f32 %v2536_v44, %v2476_v7 }
 0x3b3   : > { %v2538_v46 = vpop.f32.mrf.mxu0 }
 0x3b4   : > { %v2580_v47 = vpop.f32.mrf.mxu1  ;;  %v2584_v14 = vadd.f32 %v2538_v46, %v2477_v29 }
 0x3b5   : > { %v2540_v48 = vpop.f32.mrf.mxu0 }
 0x3b6   : > { %v3768_v51 = vpop.f32.mrf.mxu1 }
 0x3b7   : > { %v2541_v53 = vpop.f32.mrf.mxu0 }
 0x3b8   : > { %v2684_v54 = vpop.f32.mrf.mxu1 }
 0x3b9   : > { %v2643_v56 = vpop.f32.mrf.mxu0  ;;  %v2692_v18 = vadd.f32 %v2684_v54, %v2585_v12 }
 0x3ba   : > { %v3773_v58 = vpop.f32.mrf.mxu1  ;;  %v2690_v19 = vadd.f32 %v2643_v56, %v2583_v57 }
 0x3bb   : > { %v2645_v59 = vpop.f32.mrf.mxu0 }
 0x3bc   : > { %v2687_v60 = vpop.f32.mrf.mxu1  ;;  %v2691_v3 = vadd.f32 %v2645_v59, %v2584_v14 }
 0x3bd   : > { %v2647_v41 = vpop.f32.mrf.mxu0 }
 0x3be   : > { %v3774_v0 = vpop.f32.mrf.mxu1  ;;  %v3168_v41 = vpop.permute.xlu0 %3167 }
 0x3bf   : > { %v2648_v4 = vpop.f32.mrf.mxu0 }
 0x3c0   : > { %v2791_v28 = vpop.f32.mrf.mxu1 }
 0x3c1   : > { %v2750_v11 = vpop.f32.mrf.mxu0  ;;  %v2799_v23 = vadd.f32 %v2791_v28, %v2692_v18 }
 0x3c2   : > { %v3779_v15 = vpop.f32.mrf.mxu1  ;;  %v2797_v27 = vadd.f32 %v2750_v11, %v2690_v19 }
 0x3c3   : > { %v2752_v17 = vpop.f32.mrf.mxu0 }
 0x3c4   : > { %v2794_v61 = vpop.f32.mrf.mxu1  ;;  %v2798_v24 = vadd.f32 %v2752_v17, %v2691_v3 }
 0x3c5   : > { %v2754_v21 = vpop.f32.mrf.mxu0 }
 0x3c6   : > { %v3780_v25 = vpop.f32.mrf.mxu1 }
 0x3c7   : > { %v2755_v26 = vpop.f32.mrf.mxu0 }
 0x3c8   : > { %v2898_v52 = vpop.f32.mrf.mxu1 }
 0x3c9   : > { %v2857_v8 = vpop.f32.mrf.mxu0  ;;  %v2906_v35 = vadd.f32 %v2898_v52, %v2799_v23 }
 0x3ca   : > { %v3785_v31 = vpop.f32.mrf.mxu1  ;;  %v2904_v45 = vadd.f32 %v2857_v8, %v2797_v27 }
 0x3cb   : > { %v2859_v32 = vpop.f32.mrf.mxu0 }
 0x3cc   : > { %v2901_v34 = vpop.f32.mrf.mxu1  ;;  %v2905_v43 = vadd.f32 %v2859_v32, %v2798_v24 }
 0x3cd   : > { %v2861_v36 = vpop.f32.mrf.mxu0 }
 0x3ce   : > { %v3786_v38 = vpop.f32.mrf.mxu1 }
 0x3cf   : > { %v2862_v39 = vpop.f32.mrf.mxu0 }
 0x3d0   : > { %v3005_v40 = vpop.f32.mrf.mxu1 }
 0x3d1   : > { %v3013_v42 = vadd.f32 %v3005_v40, %v2906_v35  ;;  %v2964_v37 = vpop.f32.mrf.mxu0 }
 0x3d2   : > { %v3791_v5 = vpop.f32.mrf.mxu1  ;;  %v3011_v48 = vadd.f32 %v2964_v37, %v2904_v45 }
 0x3d3   : > { %v2966_v47 = vpop.f32.mrf.mxu0  ;;  %3802 = vmatmul.mubr.msk.f32.vlgmr.msra.gmra.mxu1 %vm3170_vm13, %v3013_v42 }
 0x3d4   : > { %v3012_v44 = vadd.f32 %v2966_v47, %v2905_v43  ;;  %v3008_v46 = vpop.f32.mrf.mxu1 }
 0x3d5   : > { %v2968_v51 = vpop.f32.mrf.mxu0 }
 0x3d6   : > { %3238 = vmatprep.mubr.f32.mxu0 %v3012_v44  ;;  %v3792_v53 = vpop.f32.mrf.mxu1 }
 0x3d7   : > { %v2969_v54 = vpop.f32.mrf.mxu0  ;;  %3239 = vmatmul.mubr.f32.vlgmr.msra.gmra.mxu0 %v3011_v48 }
 0x493   : > { %v3310_v56 = vpop.f32.mrf.mxu1 }
 0x495   : > { %v3803_v58 = vpop.f32.mrf.mxu1 }
 0x497   : > { %v3635_v59 = vpop.f32.mrf.mxu0 }
 0x499   : > { %v3636_v60 = vpop.f32.mrf.mxu0 }
 0x49a   : > { %v3637_v63 = vadd.f32 %v3636_v60, %v3635_v59 }
 0x49c   : > { %v3241_v0 = vadd.f32 %v3637_v63, %v3168_v41 }
 0x49e   : > { %v3311_v2 = vadd.f32 %v3310_v56, %v3241_v0 }
 0x4a0   : > { %vm3314_vm14 = vcmp.gt.f32.partialorder %v3311_v2, 0.0  ;;  %v3315_v4 = vmul.f32 0.01, %v3311_v2 }
 0x4a2   : > { %v3316_v49 = vsel %vm3314_vm14, %v3311_v2, %v3315_v4 }
 0x4a3   : > { %3318 = vst.msk [vmem:[%s276_s12] sm:$0xff] %vm3317_vm15, %v3316_v49 }
 0x4a4 PF: > { %s17_s24 = sadd.s32 1, %s3842_s24  }
 0x4a5   : > { %p14_p4 = scmp.ge.s32.totalorder %s17_s24, 4  }
 0x4a7   :  { %16 = sbr.rel (!%p14_p4) target bundleno = 1 (0x1), region = 101 }

</bundles_post_ra>
